<compile_context>
chip_gen: v7x
topology: tpu7x:2x2x1
jax: 0.10.0
libtpu: 0.0.40
codegen_flags: <defaults>
</compile_context>

<pallas_src>
import functools

import jax
import jax.numpy as jnp
from jax.experimental import pallas as pl
from jax.experimental.pallas import tpu as pltpu

EPS = 1e-5


def _round_up(x, m):
    return (x + m - 1) // m * m


def _bn_relu_conv_res_kernel(x_ref, scale_ref, shift_ref, w_ref, b_ref,
                             o_ref, pad_ref, *, W, top_pad):
    """One image per grid step.

    x_ref:     (H*W, C)   f32 channels-last flattened image (also the residual)
    scale_ref: (1, C)     f32, gamma * rsqrt(var + eps)
    shift_ref: (1, C)     f32, beta - mean * scale
    w_ref:     (3, 3C, C) matmul-dtype taps; w_ref[ky] stacks (Cin, Cout) taps
                          for kx = 0,1,2 along the contraction dim
    b_ref:     (1, C)     f32 conv bias
    o_ref:     (H*W, C)   output block
    pad_ref:   (top_pad + H*W + bot_pad, 3C) matmul-dtype packed scratch:
               lanes [0:C]   = a[y, x-1]  (dx = -1)
               lanes [C:2C]  = a[y, x  ]  (dx =  0)
               lanes [2C:3C] = a[y, x+1]  (dx = +1)
               with zero halo rows on top/bottom covering dy = -1 / +1.
    """
    HW, C = x_ref.shape
    rows = pad_ref.shape[0]
    bot_pad = rows - top_pad - HW

    x = x_ref[...]

    # ---- BatchNorm apply (stats precomputed outside) + ReLU on the VPU ------
    # Single hoisted cast to the MXU operand dtype.
    a = jnp.maximum(x * scale_ref[...] + shift_ref[...], 0.0).astype(pad_ref.dtype)

    # ---- packed scratch: zero ONLY the halo rows (interior fully rewritten) --
    pad_ref[0:top_pad, :] = jnp.zeros((top_pad, 3 * C), pad_ref.dtype)
    pad_ref[top_pad + HW:rows, :] = jnp.zeros((bot_pad, 3 * C), pad_ref.dtype)

    # dx = 0 third first; the dx = +-1 thirds are the freshly written center
    # third read back at a +-1 flat-row offset, with the x-edge masks applied
    # once here.  Masks stay (HW, 1); jnp.where broadcasts along lanes.
    ctr_lo, ctr_hi = C, 2 * C
    pad_ref[top_pad:top_pad + HW, ctr_lo:ctr_hi] = a

    col = jax.lax.broadcasted_iota(jnp.int32, (HW, 1), 0) % W
    not_left = col > 0           # pixel has a valid x-1 neighbour
    not_right = col < W - 1      # pixel has a valid x+1 neighbour

    left_src = pad_ref[top_pad - 1:top_pad - 1 + HW, ctr_lo:ctr_hi]    # a[y, x-1]
    pad_ref[top_pad:top_pad + HW, 0:C] = jnp.where(not_left, left_src, 0)
    right_src = pad_ref[top_pad + 1:top_pad + 1 + HW, ctr_lo:ctr_hi]   # a[y, x+1]
    pad_ref[top_pad:top_pad + HW, 2 * C:3 * C] = jnp.where(not_right, right_src, 0)

    # ---- 3x3 conv = three (HW, 3C) @ (3C, C) MXU matmuls, f32 accumulation ---
    # dy = -1/0/+1 is a +-W flat-row shift straight into the zero halo rows,
    # so no further masking is needed.  top_pad % 8 == 0 keeps these operand
    # loads and the interior stores sublane-aligned.
    acc = jnp.dot(pad_ref[top_pad - W:top_pad - W + HW, :], w_ref[0],
                  preferred_element_type=jnp.float32)
    acc = acc + jnp.dot(pad_ref[top_pad:top_pad + HW, :], w_ref[1],
                        preferred_element_type=jnp.float32)
    acc = acc + jnp.dot(pad_ref[top_pad + W:top_pad + W + HW, :], w_ref[2],
                        preferred_element_type=jnp.float32)
    acc = acc + b_ref[...]

    # ---- PreAct residual add (pre-BN input, tile already resident) -----------
    o_ref[...] = (x + acc).astype(o_ref.dtype)


def preact_resnet_forward_nhwc(x_nhwc, gamma, beta, conv_w, conv_b,
                               compute_dtype=jnp.bfloat16):
    """Channels-last entry point: x_nhwc (N, H, W, C); conv_w (Cout, Cin, 3, 3)."""
    N, H, W, C = x_nhwc.shape
    HW = H * W
    x3d = x_nhwc.reshape(N, HW, C).astype(jnp.float32)

    # BatchNorm2d training-mode batch stats (biased variance) in a SINGLE HBM
    # pass: sum and sum-of-squares fuse into one XLA reduce over x3d.  The
    # clamp guards against tiny negative variance from E[x^2]-E[x]^2 rounding.
    cnt = N * HW
    s1 = jnp.sum(x3d, axis=(0, 1))
    s2 = jnp.sum(jnp.square(x3d), axis=(0, 1))
    mean = s1 / cnt
    var = jnp.maximum(s2 / cnt - jnp.square(mean), 0.0)
    inv_std = jax.lax.rsqrt(var + EPS)
    scale_vec = gamma.astype(jnp.float32) * inv_std
    shift_vec = beta.astype(jnp.float32) - mean * scale_vec
    # TODO(synk): PyTorch training-mode BatchNorm2d also updates
    # running_mean/running_var (module state); forward output is unaffected.

    # Conv taps: OIHW -> (ky, kx*Cin, Cout); the contraction dim packs
    # (kx, Cin) in the same order as the packed-scratch lanes.
    w_packed = jnp.transpose(conv_w, (2, 3, 1, 0)).reshape(3, 3 * C, C)
    w_packed = w_packed.astype(compute_dtype)
    bias2 = conv_b.reshape(1, C).astype(jnp.float32)

    top_pad = _round_up(max(W, 1), 8)   # sublane-aligned interior / dy loads
    bot_pad = _round_up(max(W, 1), 8)   # >= W zero rows for the dy=+1 taps
    rows = top_pad + HW + bot_pad

    out3d = pl.pallas_call(
        functools.partial(_bn_relu_conv_res_kernel, W=W, top_pad=top_pad),
        out_shape=jax.ShapeDtypeStruct((N, HW, C), x_nhwc.dtype),
        grid=(N,),
        in_specs=[
            pl.BlockSpec((None, HW, C), lambda n: (n, 0, 0)),   # one image/step
            pl.BlockSpec((1, C), lambda n: (0, 0)),             # BN scale
            pl.BlockSpec((1, C), lambda n: (0, 0)),             # BN shift
            pl.BlockSpec((3, 3 * C, C), lambda n: (0, 0, 0)),   # packed taps
            pl.BlockSpec((1, C), lambda n: (0, 0)),             # conv bias
        ],
        out_specs=pl.BlockSpec((None, HW, C), lambda n: (n, 0, 0)),
        scratch_shapes=[pltpu.VMEM((rows, 3 * C), compute_dtype)],
        compiler_params=pltpu.CompilerParams(
            # Images are independent -> shard the batch across v7x's two TCs.
            # TODO(synk): for v7x with N == 1 / odd, add a second parallel grid
            # axis tiling H (needs a 1-row halo between H tiles).
            dimension_semantics=("parallel",),
            vmem_limit_bytes=32 * 1024 * 1024),
    )(x3d, scale_vec.reshape(1, C), shift_vec.reshape(1, C), w_packed, bias2)

    return out3d.reshape(N, H, W, C)


def preact_resnet_forward(x_nchw, gamma, beta, conv_w, conv_b,
                          compute_dtype=jnp.bfloat16):
    """NCHW interface glue matching the PyTorch module.  In a full network keep
    activations NHWC end-to-end and call preact_resnet_forward_nhwc directly
    (saves two whole-tensor HBM transpose passes)."""
    x_nhwc = jnp.transpose(x_nchw, (0, 2, 3, 1))
    out = preact_resnet_forward_nhwc(x_nhwc, gamma, beta, conv_w, conv_b,
                                     compute_dtype=compute_dtype)
    return jnp.transpose(out, (0, 3, 1, 2))


def reference_forward(x, gamma, beta, conv_w, conv_b):
    """Pure-JAX reference mirroring the PyTorch module forward (training BN)."""
    mean = jnp.mean(x, axis=(0, 2, 3), keepdims=True)
    var = jnp.mean(jnp.square(x - mean), axis=(0, 2, 3), keepdims=True)
    xn = (x - mean) * jax.lax.rsqrt(var + EPS)
    xn = xn * gamma.reshape(1, -1, 1, 1) + beta.reshape(1, -1, 1, 1)
    a = jnp.maximum(xn, 0.0)
    conv = jax.lax.conv_general_dilated(
        a, conv_w, window_strides=(1, 1), padding=((1, 1), (1, 1)),
        dimension_numbers=("NCHW", "OIHW", "NCHW"))
    conv = conv + conv_b.reshape(1, -1, 1, 1)
    return x + conv


if __name__ == "__main__":
    N, C, H, W = 2, 4, 16, 16
    key = jax.random.PRNGKey(0)
    kx, kw, kb = jax.random.split(key, 3)

    x = jax.random.normal(kx, (N, C, H, W), dtype=jnp.float32)

    # Parameters (shapes/defaults from PreActResNet.__init__):
    gamma = jnp.ones((C,), jnp.float32)     # BatchNorm2d weight default
    beta = jnp.zeros((C,), jnp.float32)     # BatchNorm2d bias default
    fan_in = C * 3 * 3
    bound = 1.0 / (fan_in ** 0.5)
    conv_w = jax.random.uniform(kw, (C, C, 3, 3), jnp.float32, -bound, bound)
    conv_b = jax.random.uniform(kb, (C,), jnp.float32, -bound, bound)

    ref = reference_forward(x, gamma, beta, conv_w, conv_b)

    fwd = jax.jit(preact_resnet_forward, static_argnames=("compute_dtype",))

    # f32 verification path (single-pass BN stats + MXU summation order give a
    # slightly looser bound than exact bitwise parity).
    out_f32 = jax.block_until_ready(
        fwd(x, gamma, beta, conv_w, conv_b, compute_dtype=jnp.float32))
    assert out_f32.shape == (N, C, H, W)
    assert jnp.allclose(out_f32, ref, atol=5e-4, rtol=5e-4), (
        float(jnp.max(jnp.abs(out_f32 - ref))))

    # Fast path: bf16 MXU operands with f32 accumulation.
    out_bf16 = jax.block_until_ready(
        fwd(x, gamma, beta, conv_w, conv_b, compute_dtype=jnp.bfloat16))
    assert out_bf16.shape == (N, C, H, W)
    assert jnp.allclose(out_bf16, ref, atol=5e-2, rtol=5e-2), (
        float(jnp.max(jnp.abs(out_bf16 - ref))))

    print("KERNEL_OK")
</pallas_src>

<mosaic_0001>
module attributes {stable_mosaic.version = 11 : i64} {
  func.func @_bn_relu_conv_res_kernel(%arg0: i32, %arg1: memref<1x256x4xf32, #tpu.memory_space<vmem>>, %arg2: memref<1x4xf32, #tpu.memory_space<vmem>>, %arg3: memref<1x4xf32, #tpu.memory_space<vmem>>, %arg4: memref<3x12x4xf32, #tpu.memory_space<vmem>>, %arg5: memref<1x4xf32, #tpu.memory_space<vmem>>, %arg6: memref<1x256x4xf32, #tpu.memory_space<vmem>>, %arg7: memref<288x12xf32, #tpu.memory_space<vmem>>) attributes {dimension_semantics = [#tpu.dimension_semantics<parallel>], iteration_bounds = array<i64: 2>, scalar_prefetch = 0 : i64, scratch_operands = 1 : i64, tpu.core_type = #tpu.core_type<tc>, window_params = [{transform_indices = @transform_0, window_bounds = array<i64: 1, 256, 4>}, {pipeline_mode = #tpu.pipeline_mode<synchronous>, transform_indices = @transform_1, window_bounds = array<i64: 1, 4>}, {pipeline_mode = #tpu.pipeline_mode<synchronous>, transform_indices = @transform_2, window_bounds = array<i64: 1, 4>}, {pipeline_mode = #tpu.pipeline_mode<synchronous>, transform_indices = @transform_3, window_bounds = array<i64: 3, 12, 4>}, {pipeline_mode = #tpu.pipeline_mode<synchronous>, transform_indices = @transform_4, window_bounds = array<i64: 1, 4>}, {transform_indices = @transform_5, window_bounds = array<i64: 1, 256, 4>}]} {
    %c0 = arith.constant 0 : index
    %c0_0 = arith.constant 0 : index
    %c0_1 = arith.constant 0 : index
    %0 = vector.load %arg1[%c0, %c0_0, %c0_1] : memref<1x256x4xf32, #tpu.memory_space<vmem>>, vector<1x256x4xf32>
    %1 = vector.shape_cast %0 : vector<1x256x4xf32> to vector<256x4xf32>
    %c0_2 = arith.constant 0 : index
    %c0_3 = arith.constant 0 : index
    %2 = vector.load %arg2[%c0_2, %c0_3] : memref<1x4xf32, #tpu.memory_space<vmem>>, vector<1x4xf32>
    %3 = vector.broadcast %2 : vector<1x4xf32> to vector<256x4xf32>
    %4 = arith.mulf %1, %3 : vector<256x4xf32>
    %c0_4 = arith.constant 0 : index
    %c0_5 = arith.constant 0 : index
    %5 = vector.load %arg3[%c0_4, %c0_5] : memref<1x4xf32, #tpu.memory_space<vmem>>, vector<1x4xf32>
    %6 = vector.broadcast %5 : vector<1x4xf32> to vector<256x4xf32>
    %7 = arith.addf %4, %6 : vector<256x4xf32>
    %cst = arith.constant 0.000000e+00 : f32
    %8 = vector.broadcast %cst : f32 to vector<256x4xf32>
    %9 = arith.maximumf %7, %8 : vector<256x4xf32>
    %cst_6 = arith.constant 0.000000e+00 : f32
    %10 = vector.broadcast %cst_6 : f32 to vector<16x12xf32>
    %c0_7 = arith.constant 0 : index
    %c0_8 = arith.constant 0 : index
    %11 = vector.load %arg7[%c0_7, %c0_8] : memref<288x12xf32, #tpu.memory_space<vmem>>, vector<16x12xf32>
    tpu.vector_store %arg7[%c0_7, %c0_8], %10 {strides = array<i32>} : memref<288x12xf32, #tpu.memory_space<vmem>>, vector<16x12xf32>,
    %cst_9 = arith.constant 0.000000e+00 : f32
    %12 = vector.broadcast %cst_9 : f32 to vector<16x12xf32>
    %c272 = arith.constant 272 : index
    %c0_10 = arith.constant 0 : index
    %13 = vector.load %arg7[%c272, %c0_10] : memref<288x12xf32, #tpu.memory_space<vmem>>, vector<16x12xf32>
    tpu.vector_store %arg7[%c272, %c0_10], %12 {strides = array<i32>} : memref<288x12xf32, #tpu.memory_space<vmem>>, vector<16x12xf32>,
    %c16 = arith.constant 16 : index
    %c4 = arith.constant 4 : index
    %14 = vector.load %arg7[%c16, %c4] : memref<288x12xf32, #tpu.memory_space<vmem>>, vector<256x4xf32>
    tpu.vector_store %arg7[%c16, %c4], %9 {strides = array<i32>} : memref<288x12xf32, #tpu.memory_space<vmem>>, vector<256x4xf32>,
    %15 = tpu.iota {dimensions = array<i32: 0>} : vector<256x1xi32>
    %c16_i32 = arith.constant 16 : i32
    %c0_i32 = arith.constant 0 : i32
    %16 = arith.cmpi eq, %c16_i32, %c0_i32 : i32
    %c1_i32 = arith.constant 1 : i32
    %17 = arith.select %16, %c1_i32, %c16_i32 : i32
    %18 = vector.broadcast %17 : i32 to vector<256x1xi32>
    %19 = arith.remsi %15, %18 : vector<256x1xi32>
    %c0_i32_11 = arith.constant 0 : i32
    %20 = vector.broadcast %c0_i32_11 : i32 to vector<256x1xi32>
    %21 = arith.cmpi ne, %19, %20 : vector<256x1xi32>
    %c0_i32_12 = arith.constant 0 : i32
    %22 = vector.broadcast %c0_i32_12 : i32 to vector<256x1xi32>
    %23 = arith.cmpi slt, %19, %22 : vector<256x1xi32>
    %c0_i32_13 = arith.constant 0 : i32
    %24 = arith.cmpi slt, %17, %c0_i32_13 : i32
    %25 = vector.broadcast %24 : i1 to vector<256x1xi1>
    %26 = vector.broadcast %25 : vector<256x1xi1> to vector<256x1xi1>
    %27 = arith.xori %23, %26 : vector<256x1xi1>
    %28 = arith.andi %27, %21 : vector<256x1xi1>
    %29 = vector.broadcast %17 : i32 to vector<256x1xi32>
    %30 = arith.addi %19, %29 : vector<256x1xi32>
    %31 = arith.select %28, %30, %19 : vector<256x1xi1>, vector<256x1xi32>
    %c0_i32_14 = arith.constant 0 : i32
    %32 = vector.broadcast %c0_i32_14 : i32 to vector<256x1xi32>
    %33 = arith.cmpi sgt, %31, %32 : vector<256x1xi32>
    %c15_i32 = arith.constant 15 : i32
    %34 = vector.broadcast %c15_i32 : i32 to vector<256x1xi32>
    %35 = arith.cmpi slt, %31, %34 : vector<256x1xi32>
    %c15 = arith.constant 15 : index
    %c4_15 = arith.constant 4 : index
    %36 = vector.load %arg7[%c15, %c4_15] : memref<288x12xf32, #tpu.memory_space<vmem>>, vector<256x4xf32>
    %c0_i32_16 = arith.constant 0 : i32
    %37 = arith.sitofp %c0_i32_16 : i32 to f32
    %38 = vector.shape_cast %33 : vector<256x1xi1> to vector<256x1xi1>
    %39 = vector.broadcast %38 : vector<256x1xi1> to vector<256x4xi1>
    %40 = vector.broadcast %37 : f32 to vector<256x4xf32>
    %41 = arith.select %39, %36, %40 : vector<256x4xi1>, vector<256x4xf32>
    %c16_17 = arith.constant 16 : index
    %c0_18 = arith.constant 0 : index
    %42 = vector.load %arg7[%c16_17, %c0_18] : memref<288x12xf32, #tpu.memory_space<vmem>>, vector<256x4xf32>
    tpu.vector_store %arg7[%c16_17, %c0_18], %41 {strides = array<i32>} : memref<288x12xf32, #tpu.memory_space<vmem>>, vector<256x4xf32>,
    %c17 = arith.constant 17 : index
    %c4_19 = arith.constant 4 : index
    %43 = vector.load %arg7[%c17, %c4_19] : memref<288x12xf32, #tpu.memory_space<vmem>>, vector<256x4xf32>
    %c0_i32_20 = arith.constant 0 : i32
    %44 = arith.sitofp %c0_i32_20 : i32 to f32
    %45 = vector.shape_cast %35 : vector<256x1xi1> to vector<256x1xi1>
    %46 = vector.broadcast %45 : vector<256x1xi1> to vector<256x4xi1>
    %47 = vector.broadcast %44 : f32 to vector<256x4xf32>
    %48 = arith.select %46, %43, %47 : vector<256x4xi1>, vector<256x4xf32>
    %c16_21 = arith.constant 16 : index
    %c8 = arith.constant 8 : index
    %49 = vector.load %arg7[%c16_21, %c8] : memref<288x12xf32, #tpu.memory_space<vmem>>, vector<256x4xf32>
    tpu.vector_store %arg7[%c16_21, %c8], %48 {strides = array<i32>} : memref<288x12xf32, #tpu.memory_space<vmem>>, vector<256x4xf32>,
    %c0_22 = arith.constant 0 : index
    %c0_23 = arith.constant 0 : index
    %50 = vector.load %arg7[%c0_22, %c0_23] : memref<288x12xf32, #tpu.memory_space<vmem>>, vector<256x12xf32>
    %c0_24 = arith.constant 0 : index
    %c0_25 = arith.constant 0 : index
    %c0_26 = arith.constant 0 : index
    %51 = vector.load %arg4[%c0_24, %c0_25, %c0_26] : memref<3x12x4xf32, #tpu.memory_space<vmem>>, vector<1x12x4xf32>
    %52 = vector.shape_cast %51 : vector<1x12x4xf32> to vector<12x4xf32>
    %cst_27 = arith.constant dense<0.000000e+00> : vector<256x4xf32>
    %53 = tpu.matmul %50, %52, %cst_27 {dimension_numbers = #tpu.dot_dimension_numbers<[1], [0], [0], [1], [0, 0, 1, 1], [], []>} : vector<256x12xf32>, vector<12x4xf32>, vector<256x4xf32> -> vector<256x4xf32>
    %c16_28 = arith.constant 16 : index
    %c0_29 = arith.constant 0 : index
    %54 = vector.load %arg7[%c16_28, %c0_29] : memref<288x12xf32, #tpu.memory_space<vmem>>, vector<256x12xf32>
    %c1 = arith.constant 1 : index
    %c0_30 = arith.constant 0 : index
    %c0_31 = arith.constant 0 : index
    %55 = vector.load %arg4[%c1, %c0_30, %c0_31] : memref<3x12x4xf32, #tpu.memory_space<vmem>>, vector<1x12x4xf32>
    %56 = vector.shape_cast %55 : vector<1x12x4xf32> to vector<12x4xf32>
    %cst_32 = arith.constant dense<0.000000e+00> : vector<256x4xf32>
    %57 = tpu.matmul %54, %56, %cst_32 {dimension_numbers = #tpu.dot_dimension_numbers<[1], [0], [0], [1], [0, 0, 1, 1], [], []>} : vector<256x12xf32>, vector<12x4xf32>, vector<256x4xf32> -> vector<256x4xf32>
    %58 = arith.addf %53, %57 : vector<256x4xf32>
    %c32 = arith.constant 32 : index
    %c0_33 = arith.constant 0 : index
    %59 = vector.load %arg7[%c32, %c0_33] : memref<288x12xf32, #tpu.memory_space<vmem>>, vector<256x12xf32>
    %c2 = arith.constant 2 : index
    %c0_34 = arith.constant 0 : index
    %c0_35 = arith.constant 0 : index
    %60 = vector.load %arg4[%c2, %c0_34, %c0_35] : memref<3x12x4xf32, #tpu.memory_space<vmem>>, vector<1x12x4xf32>
    %61 = vector.shape_cast %60 : vector<1x12x4xf32> to vector<12x4xf32>
    %cst_36 = arith.constant dense<0.000000e+00> : vector<256x4xf32>
    %62 = tpu.matmul %59, %61, %cst_36 {dimension_numbers = #tpu.dot_dimension_numbers<[1], [0], [0], [1], [0, 0, 1, 1], [], []>} : vector<256x12xf32>, vector<12x4xf32>, vector<256x4xf32> -> vector<256x4xf32>
    %63 = arith.addf %58, %62 : vector<256x4xf32>
    %c0_37 = arith.constant 0 : index
    %c0_38 = arith.constant 0 : index
    %64 = vector.load %arg5[%c0_37, %c0_38] : memref<1x4xf32, #tpu.memory_space<vmem>>, vector<1x4xf32>
    %65 = vector.broadcast %64 : vector<1x4xf32> to vector<256x4xf32>
    %66 = arith.addf %63, %65 : vector<256x4xf32>
    %67 = arith.addf %1, %66 : vector<256x4xf32>
    %c0_39 = arith.constant 0 : index
    %c0_40 = arith.constant 0 : index
    %c0_41 = arith.constant 0 : index
    %68 = vector.load %arg6[%c0_39, %c0_40, %c0_41] : memref<1x256x4xf32, #tpu.memory_space<vmem>>, vector<1x256x4xf32>
    %69 = vector.shape_cast %68 : vector<1x256x4xf32> to vector<256x4xf32>
    %70 = vector.shape_cast %67 : vector<256x4xf32> to vector<1x256x4xf32>
    tpu.vector_store %arg6[%c0_39, %c0_40, %c0_41], %70 {strides = array<i32>} : memref<1x256x4xf32, #tpu.memory_space<vmem>>, vector<1x256x4xf32>,
    return
  }
  func.func @transform_0(%arg0: i32) -> (i32, i32, i32) {
    %c0_i32 = arith.constant 0 : i32
    %c0_i32_0 = arith.constant 0 : i32
    %c0_i32_1 = arith.constant 0 : i32
    return %arg0, %c0_i32, %c0_i32_0 : i32, i32, i32
  }
  func.func @transform_1(%arg0: i32) -> (i32, i32) {
    %c0_i32 = arith.constant 0 : i32
    %c0_i32_0 = arith.constant 0 : i32
    %c0_i32_1 = arith.constant 0 : i32
    return %c0_i32, %c0_i32_0 : i32, i32
  }
  func.func @transform_2(%arg0: i32) -> (i32, i32) {
    %c0_i32 = arith.constant 0 : i32
    %c0_i32_0 = arith.constant 0 : i32
    %c0_i32_1 = arith.constant 0 : i32
    return %c0_i32, %c0_i32_0 : i32, i32
  }
  func.func @transform_3(%arg0: i32) -> (i32, i32, i32) {
    %c0_i32 = arith.constant 0 : i32
    %c0_i32_0 = arith.constant 0 : i32
    %c0_i32_1 = arith.constant 0 : i32
    %c0_i32_2 = arith.constant 0 : i32
    return %c0_i32, %c0_i32_0, %c0_i32_1 : i32, i32, i32
  }
  func.func @transform_4(%arg0: i32) -> (i32, i32) {
    %c0_i32 = arith.constant 0 : i32
    %c0_i32_0 = arith.constant 0 : i32
    %c0_i32_1 = arith.constant 0 : i32
    return %c0_i32, %c0_i32_0 : i32, i32
  }
  func.func @transform_5(%arg0: i32) -> (i32, i32, i32) {
    %c0_i32 = arith.constant 0 : i32
    %c0_i32_0 = arith.constant 0 : i32
    %c0_i32_1 = arith.constant 0 : i32
    return %arg0, %c0_i32, %c0_i32_0 : i32, i32, i32
  }
}

</mosaic_0001>

<bundles_post_ra>
// kernel: preact_resnet_forward.1
= control target key start
LH: loop header
LB: loop body
LE: loop exit
PB: predicated region body
PF: predicated region fallthrough
CT: control target
= control target key end

     0   :  { %s3286_s18 = smov 0   ;;  %s4001_s0 = inlined_call_operand.vmem [shape: f32[2,256,4], index: 0, kind: input, shape index: {}]   ;;  %s4002_s1 = inlined_call_operand.vmem [shape: f32[1,4], index: 1, kind: input, shape index: {}]   ;;  %s4003_s2 = inlined_call_operand.vmem [shape: f32[1,4], index: 2, kind: input, shape index: {}]   ;;  %s4004_s3 = inlined_call_operand.vmem [shape: f32[3,12,4], index: 3, kind: input, shape index: {}]   ;;  %s4005_s4 = inlined_call_operand.vmem [shape: f32[1,4], index: 4, kind: input, shape index: {}]   ;;  %s4006_s5 = inlined_call_operand.vmem [shape: f32[2,256,4], index: 5, kind: output, shape index: {}]  }
   0x1 LB: > { %s2739_s19 = sadd.s32 4294967295, %s3250_s18   ;;  %p2743_p0 = scmp.ge.s32.totalorder %s3250_s18, 1  ;;  %s3250_s18 = sphi %s3286_s18, %s15_s18  }
   0x2   : > { %p187_p1 = scmp.lt.s32.totalorder %s3250_s18, 3 }
   0x4   : > { %p188_p2 = pnand %p2743_p0, %p187_p1 }
   0x5   : > { %p215_p3 = scmp.lt.s32.totalorder (!%p188_p2), %s2739_s19, 1  ;;  %vm367_vm0 = vcmask (!%p188_p2), 97280   ;;  %v3252_v0 = vmov (!%p188_p2), 0.0   ;;  %v3304_v1 = vld [vmem:[%s4002_s1] ss:$0 sm:$0xff] (!%p188_p2)  ;;  %s3253_s28 = smov (!%p188_p2), 4  }
   0x6   : > { %191 = sbr.rel (%p188_p2) target bundleno = 710 (0x2c6), region = 40  ;;  %369 = vst.msk [vmem:[#allocation2 + $0x8] sm:$0xff] (!%p188_p2), %vm367_vm0, %v3252_v0  ;;  %368 = vst.msk [vmem:[#allocation2] sm:$0xff] (!%p188_p2), %vm367_vm0, %v3252_v0  ;;  %v3316_v2 = vld [vmem:[%s4003_s2] ss:$0 sm:$0xff] (!%p188_p2)  ;;  %vm500_vm1 = vcmask (!%p188_p2), 64544  }
   0x7   : > { %370 = vst.msk [vmem:[#allocation2 + $0x110] sm:$0xff] (!%p188_p2), %vm367_vm0, %v3252_v0  ;;  %371 = vst.msk [vmem:[#allocation2 + $0x118] sm:$0xff] (!%p188_p2), %vm367_vm0, %v3252_v0  ;;  %s3254_s29 = smov (!%p188_p2), 124  }
   0xd   : > { %s4010_s19 = smov (!%p215_p3, %s2739_s19), 1 }
   0xe   : > { %s2856_s20 = sshll.u32 %s4010_s19, 8 }
   0xf   : > { %s3311_s25 = scalar_lea.vmem %s4001_s0, %s2856_s20  ;;  %s3863_s24 = scalar_lea.vmem %s4006_s5, %s2856_s20 }
  0x10   : > { %v227_v3 = vld [vmem:[%s3311_s25 + $0x10] sm:$0xff]  ;;  %v225_v4 = vld [vmem:[%s3311_s25] sm:$0xff]  ;;  %v228_v5 = vld [vmem:[%s3311_s25 + $0x18] sm:$0xff] }
  0x11   : > { %v266_v6 = vmul.f32 %v3304_v1, %v227_v3  ;;  %v264_v7 = vmul.f32 %v3304_v1, %v225_v4  ;;  %v267_v8 = vmul.f32 %v3304_v1, %v228_v5  ;;  %v226_v9 = vld [vmem:[%s3311_s25 + $0x8] sm:$0xff]  ;;  %v229_v11 = vld [vmem:[%s3311_s25 + $0x20] sm:$0xff]  ;;  %v232_v18 = vld [vmem:[%s3311_s25 + $0x38] sm:$0xff] }
  0x12   : > { %v230_v10 = vld [vmem:[%s3311_s25 + $0x28] sm:$0xff]  ;;  %v265_v12 = vmul.f32 %v3304_v1, %v226_v9  ;;  %v268_v17 = vmul.f32 %v3304_v1, %v229_v11  ;;  %v231_v20 = vld [vmem:[%s3311_s25 + $0x30] sm:$0xff]  ;;  %v271_v24 = vmul.f32 %v3304_v1, %v232_v18  ;;  %v233_v30 = vld [vmem:[%s3311_s25 + $0x40] sm:$0xff] }
  0x13   : > { %v269_v13 = vmul.f32 %v3304_v1, %v230_v10  ;;  %v305_v14 = vadd.f32 %v3316_v2, %v266_v6  ;;  %v303_v15 = vadd.f32 %v3316_v2, %v264_v7  ;;  %v306_v16 = vadd.f32 %v3316_v2, %v267_v8  ;;  %v234_v29 = vld [vmem:[%s3311_s25 + $0x48] sm:$0xff]  ;;  %v236_v37 = vld [vmem:[%s3311_s25 + $0x58] sm:$0xff]  ;;  %v235_v38 = vld [vmem:[%s3311_s25 + $0x50] sm:$0xff] }
  0x14   : > { %v304_v19 = vadd.f32 %v3316_v2, %v265_v12  ;;  %v307_v27 = vadd.f32 %v3316_v2, %v268_v17  ;;  %v270_v28 = vmul.f32 %v3304_v1, %v231_v20  ;;  %v310_v32 = vadd.f32 %v3316_v2, %v271_v24  ;;  %v238_v45 = vld [vmem:[%s3311_s25 + $0x68] sm:$0xff]  ;;  %v237_v46 = vld [vmem:[%s3311_s25 + $0x60] sm:$0xff]  ;;  %v240_v53 = vld [vmem:[%s3311_s25 + $0x78] sm:$0xff] }
  0x15   : > { %v337_v21 = vmax.f32 %v305_v14, 0.0  ;;  %v335_v22 = vmax.f32 %v303_v15, 0.0  ;;  %v308_v23 = vadd.f32 %v3316_v2, %v269_v13  ;;  %v338_v25 = vmax.f32 %v306_v16, 0.0  ;;  %v239_v54 = vld [vmem:[%s3311_s25 + $0x70] sm:$0xff]  ;;  %v242_v61 = vld [vmem:[%s3311_s25 + $0x88] sm:$0xff]  ;;  %v241_v62 = vld [vmem:[%s3311_s25 + $0x80] sm:$0xff] }
  0x16   : > { %v336_v26 = vmax.f32 %v304_v19, 0.0  ;;  %v339_v33 = vmax.f32 %v307_v27, 0.0  ;;  %v309_v34 = vadd.f32 %v3316_v2, %v270_v28  ;;  %v273_v35 = vmul.f32 %v3304_v1, %v234_v29  ;;  %v244_v7 = vld [vmem:[%s3311_s25 + $0x98] sm:$0xff]  ;;  %v243_v8 = vld [vmem:[%s3311_s25 + $0x90] sm:$0xff]  ;;  %v246_v15 = vld [vmem:[%s3311_s25 + $0xa8] sm:$0xff] }
  0x17   : > { %408 = vrot.lane.b32.xlu1 %v337_v21, %s3253_s28  ;;  %404 = vrot.lane.b32.xlu0 %v335_v22, %s3253_s28  ;;  %v340_v31 = vmax.f32 %v308_v23, 0.0  ;;  %v272_v36 = vmul.f32 %v3304_v1, %v233_v30  ;;  %v342_v39 = vmax.f32 %v310_v32, 0.0  ;;  %v275_v40 = vmul.f32 %v3304_v1, %v236_v37  ;;  %v245_v16 = vld [vmem:[%s3311_s25 + $0xa0] sm:$0xff]  ;;  %v248_v23 = vld [vmem:[%s3311_s25 + $0xb8] sm:$0xff] }
  0x18   : > { %v341_v41 = vmax.f32 %v309_v34, 0.0  ;;  %v312_v42 = vadd.f32 %v3316_v2, %v273_v35  ;;  %v274_v44 = vmul.f32 %v3304_v1, %v235_v38  ;;  %v277_v47 = vmul.f32 %v3304_v1, %v238_v45  ;;  %v247_v24 = vld [vmem:[%s3311_s25 + $0xb0] sm:$0xff]  ;;  %v249_v32 = vld [vmem:[%s3311_s25 + $0xc0] sm:$0xff] }
  0x19   : > { %v311_v43 = vadd.f32 %v3316_v2, %v272_v36  ;;  %v276_v48 = vmul.f32 %v3304_v1, %v237_v46  ;;  %v314_v51 = vadd.f32 %v3316_v2, %v275_v40  ;;  %v279_v56 = vmul.f32 %v3304_v1, %v240_v53  ;;  %v251_v40 = vld [vmem:[%s3311_s25 + $0xd0] sm:$0xff] }
  0x1a   : > { %v344_v49 = vmax.f32 %v312_v42, 0.0  ;;  %v313_v52 = vadd.f32 %v3316_v2, %v274_v44  ;;  %v316_v55 = vadd.f32 %v3316_v2, %v277_v47  ;;  %v278_v60 = vmul.f32 %v3304_v1, %v239_v54  ;;  %v254_v47 = vld [vmem:[%s3311_s25 + $0xe8] sm:$0xff] }
  0x1b   : > { %410 = vrot.lane.b32.xlu1 %v338_v25, %s3253_s28  ;;  %406 = vrot.lane.b32.xlu0 %v336_v26, %s3253_s28  ;;  %v343_v50 = vmax.f32 %v311_v43, 0.0  ;;  %v346_v57 = vmax.f32 %v314_v51, 0.0  ;;  %v315_v59 = vadd.f32 %v3316_v2, %v276_v48  ;;  %v318_v0 = vadd.f32 %v3316_v2, %v279_v56  ;;  %v253_v48 = vld [vmem:[%s3311_s25 + $0xe0] sm:$0xff]  ;;  %v255_v56 = vld [vmem:[%s3311_s25 + $0xf0] sm:$0xff] }
  0x1c   : > { %v345_v58 = vmax.f32 %v313_v52, 0.0  ;;  %v348_v63 = vmax.f32 %v316_v55, 0.0  ;;  %v317_v4 = vadd.f32 %v3316_v2, %v278_v60  ;;  %v281_v5 = vmul.f32 %v3304_v1, %v242_v61  ;;  %v256_v55 = vld [vmem:[%s3311_s25 + $0xf8] sm:$0xff] }
  0x1d   : > { %v347_v3 = vmax.f32 %v315_v59, 0.0  ;;  %v280_v6 = vmul.f32 %v3304_v1, %v241_v62  ;;  %v350_v9 = vmax.f32 %v318_v0, 0.0  ;;  %v283_v10 = vmul.f32 %v3304_v1, %v244_v7 }
  0x1e   : > { %v349_v11 = vmax.f32 %v317_v4, 0.0  ;;  %v320_v12 = vadd.f32 %v3316_v2, %v281_v5  ;;  %v282_v14 = vmul.f32 %v3304_v1, %v243_v8  ;;  %v285_v17 = vmul.f32 %v3304_v1, %v246_v15 }
  0x1f   : > { %414 = vrot.lane.b32.xlu1 %v340_v31, %s3253_s28  ;;  %412 = vrot.lane.b32.xlu0 %v339_v33, %s3253_s28  ;;  %v319_v13 = vadd.f32 %v3316_v2, %v280_v6  ;;  %v284_v18 = vmul.f32 %v3304_v1, %v245_v16  ;;  %v322_v21 = vadd.f32 %v3316_v2, %v283_v10  ;;  %v250_v31 = vld [vmem:[%s3311_s25 + $0xc8] sm:$0xff] }
  0x20   : > { %v352_v19 = vmax.f32 %v320_v12, 0.0  ;;  %v321_v22 = vadd.f32 %v3316_v2, %v282_v14  ;;  %v324_v25 = vadd.f32 %v3316_v2, %v285_v17  ;;  %v287_v26 = vmul.f32 %v3304_v1, %v248_v23 }
  0x21   : > { %v351_v20 = vmax.f32 %v319_v13, 0.0  ;;  %v354_v27 = vmax.f32 %v322_v21, 0.0  ;;  %v323_v29 = vadd.f32 %v3316_v2, %v284_v18  ;;  %v286_v30 = vmul.f32 %v3304_v1, %v247_v24 }
  0x22   : > { %v353_v28 = vmax.f32 %v321_v22, 0.0  ;;  %v356_v33 = vmax.f32 %v324_v25, 0.0  ;;  %v326_v34 = vadd.f32 %v3316_v2, %v287_v26  ;;  %v289_v37 = vmul.f32 %v3304_v1, %v250_v31 }
  0x23   : > { %418 = vrot.lane.b32.xlu1 %v342_v39, %s3253_s28  ;;  %416 = vrot.lane.b32.xlu0 %v341_v41, %s3253_s28  ;;  %v355_v35 = vmax.f32 %v323_v29, 0.0  ;;  %v325_v36 = vadd.f32 %v3316_v2, %v286_v30  ;;  %v288_v38 = vmul.f32 %v3304_v1, %v249_v32  ;;  %v252_v39 = vld [vmem:[%s3311_s25 + $0xd8] sm:$0xff]  ;;  %v290_v46 = vmul.f32 %v3304_v1, %v251_v40 }
  0x24   : > { %v358_v41 = vmax.f32 %v326_v34, 0.0  ;;  %v291_v42 = vmul.f32 %v3304_v1, %v252_v39  ;;  %v328_v44 = vadd.f32 %v3316_v2, %v289_v37  ;;  %v294_v62 = vmul.f32 %v3304_v1, %v255_v56 }
  0x25   : > { %v357_v43 = vmax.f32 %v325_v36, 0.0  ;;  %v327_v45 = vadd.f32 %v3316_v2, %v288_v38  ;;  %v329_v54 = vadd.f32 %v3316_v2, %v290_v46 }
  0x26   : > { %v360_v51 = vmax.f32 %v328_v44, 0.0  ;;  %v330_v53 = vadd.f32 %v3316_v2, %v291_v42  ;;  %v333_v4 = vadd.f32 %v3316_v2, %v294_v62 }
  0x27   : > { %422 = vrot.lane.b32.xlu1 %v344_v49, %s3253_s28  ;;  %420 = vrot.lane.b32.xlu0 %v343_v50, %s3253_s28  ;;  %v293_v49 = vmul.f32 %v3304_v1, %v254_v47  ;;  %v292_v50 = vmul.f32 %v3304_v1, %v253_v48  ;;  %v359_v52 = vmax.f32 %v327_v45, 0.0  ;;  %v361_v60 = vmax.f32 %v329_v54, 0.0 }
  0x28   : > { %v362_v59 = vmax.f32 %v330_v53, 0.0  ;;  %v365_v6 = vmax.f32 %v333_v4, 0.0 }
  0x29   : > { %v331_v61 = vadd.f32 %v3316_v2, %v292_v50 }
  0x2b   : > { %426 = vrot.lane.b32.xlu1 %v346_v57, %s3253_s28  ;;  %424 = vrot.lane.b32.xlu0 %v345_v58, %s3253_s28  ;;  %v332_v57 = vadd.f32 %v3316_v2, %v293_v49  ;;  %v295_v58 = vmul.f32 %v3304_v1, %v256_v55  ;;  %v363_v0 = vmax.f32 %v331_v61, 0.0  ;;  %v533_v1 = vlaneseq }
  0x2d   : > { %v3446_v7 = vshrl.u32 %v533_v1, 7 }
  0x2f   : > { %430 = vrot.lane.b32.xlu1 %v348_v63, %s3253_s28  ;;  %428 = vrot.lane.b32.xlu0 %v347_v3, %s3253_s28  ;;  %v364_v63 = vmax.f32 %v332_v57, 0.0  ;;  %v334_v3 = vadd.f32 %v3316_v2, %v295_v58  ;;  %v570_v2 = vand.u32 15, %v3446_v7  ;;  %v536_v10 = vadd.s32 16, %v3446_v7 }
  0x30   : > { %v538_v14 = vadd.s32 32, %v3446_v7  ;;  %v544_v34 = vadd.s32 80, %v3446_v7  ;;  %v548_v48 = vadd.s32 112, %v3446_v7  ;;  %v550_v55 = vadd.s32 128, %v3446_v7 }
  0x31   : > { %v366_v5 = vmax.f32 %v334_v3, 0.0  ;;  %vm950_vm2 = vcmp.gt.s32.totalorder %v570_v2, 0  ;;  %v584_v13 = vand.u32 15, %v536_v10  ;;  %v552_v62 = vadd.s32 144, %v3446_v7 }
  0x32   : > { %v640_v40 = vand.u32 15, %v544_v34  ;;  %v668_v54 = vand.u32 15, %v548_v48  ;;  %v682_v61 = vand.u32 15, %v550_v55  ;;  %v554_v1 = vadd.s32 160, %v3446_v7  ;;  %v1624_v55 = vld [vmem:[%s4004_s3] sm:$0xff] }
  0x33   : > { %434 = vrot.lane.b32.xlu1 %v350_v9, %s3253_s28  ;;  %432 = vrot.lane.b32.xlu0 %v349_v11, %s3253_s28  ;;  %vm952_vm3 = vcmp.gt.s32.totalorder %v584_v13, 0  ;;  %v556_v13 = vadd.s32 176, %v3446_v7  ;;  %v562_v34 = vadd.s32 224, %v3446_v7 }
  0x34   : > { %vm960_vm7 = vcmp.gt.s32.totalorder %v640_v40, 0  ;;  %vm964_vm9 = vcmp.gt.s32.totalorder %v668_v54, 0  ;;  %vm966_vm10 = vcmp.gt.s32.totalorder %v682_v61, 0  ;;  %v2750_v61 = vld [vmem:[%s4004_s3 + $0x10] sm:$0xff] }
  0x35   : > { %v766_v40 = vand.u32 15, %v562_v34  ;;  %v545_v34 = vadd.s32 88, %v3446_v7 }
  0x37   : > { %438 = vrot.lane.b32.xlu1 %v352_v19, %s3253_s28  ;;  %436 = vrot.lane.b32.xlu0 %v351_v20, %s3253_s28  ;;  %v598_v19 = vand.u32 15, %v538_v14  ;;  %v540_v20 = vadd.s32 48, %v3446_v7 }
  0x39   : > { %vm954_vm4 = vcmp.gt.s32.totalorder %v598_v19, 0  ;;  %v612_v26 = vand.u32 15, %v540_v20  ;;  %v724_v19 = vand.u32 15, %v556_v13  ;;  %v558_v20 = vadd.s32 192, %v3446_v7 }
  0x3a   : > { %v539_v13 = vadd.s32 40, %v3446_v7 }
  0x3b   : > { %442 = vrot.lane.b32.xlu1 %v354_v27, %s3253_s28  ;;  %440 = vrot.lane.b32.xlu0 %v353_v28, %s3253_s28  ;;  %v542_v27 = vadd.s32 64, %v3446_v7  ;;  %vm956_vm5 = vcmp.gt.s32.totalorder %v612_v26, 0  ;;  %vm972_vm13 = vcmp.gt.s32.totalorder %v724_v19, 0  ;;  %v738_v26 = vand.u32 15, %v558_v20 }
  0x3c   : > { %v605_v19 = vand.u32 15, %v539_v13  ;;  %v541_v20 = vadd.s32 56, %v3446_v7 }
  0x3d   : > { %vm974_vm14 = vcmp.gt.s32.totalorder %v738_v26, 0 }
  0x3e   : > { %v619_v26 = vand.u32 15, %v541_v20 }
  0x3f   : > { %446 = vrot.lane.b32.xlu1 %v356_v33, %s3253_s28  ;;  %444 = vrot.lane.b32.xlu0 %v355_v35, %s3253_s28  ;;  %v626_v33 = vand.u32 15, %v542_v27  ;;  %v560_v27 = vadd.s32 208, %v3446_v7 }
  0x41   : > { %vm958_vm6 = vcmp.gt.s32.totalorder %v626_v33, 0  ;;  %v752_v33 = vand.u32 15, %v560_v27  ;;  %v543_v27 = vadd.s32 72, %v3446_v7 }
  0x43   : > { %450 = vrot.lane.b32.xlu1 %v358_v41, %s3253_s28  ;;  %448 = vrot.lane.b32.xlu0 %v357_v43, %s3253_s28  ;;  %v546_v41 = vadd.s32 96, %v3446_v7  ;;  %vm976_vm15 = vcmp.gt.s32.totalorder %v752_v33, 0  ;;  %v633_v33 = vand.u32 15, %v543_v27 }
  0x45   : > { %v654_v47 = vand.u32 15, %v546_v41  ;;  %v564_v41 = vadd.s32 240, %v3446_v7 }
  0x47   : > { %454 = vrot.lane.b32.xlu1 %v360_v51, %s3253_s28  ;;  %452 = vrot.lane.b32.xlu0 %v359_v52, %s3253_s28  ;;  %vm962_vm8 = vcmp.gt.s32.totalorder %v654_v47, 0  ;;  %v780_v47 = vand.u32 15, %v564_v41  ;;  %v547_v41 = vadd.s32 104, %v3446_v7 }
  0x4b   : > { %458 = vrot.lane.b32.xlu1 %v362_v59, %s3253_s28  ;;  %456 = vrot.lane.b32.xlu0 %v361_v60, %s3253_s28 }
  0x4f   : > { %462 = vrot.lane.b32.xlu1 %v364_v63, %s3253_s28  ;;  %460 = vrot.lane.b32.xlu0 %v363_v0, %s3253_s28 }
  0x53   : > { %466 = vrot.lane.b32.xlu1 %v366_v5, %s3253_s28  ;;  %464 = vrot.lane.b32.xlu0 %v365_v6, %s3253_s28  ;;  %v696_v6 = vand.u32 15, %v552_v62  ;;  %v2751_v62 = vld [vmem:[%s4004_s3 + $0x18] sm:$0xf] }
  0x55   : > { %vm968_vm11 = vcmp.gt.s32.totalorder %v696_v6, 0 }
  0x89   : > { %v409_v8 = vpop.permute.xlu1 %408  ;;  %v405_v9 = vpop.permute.xlu0 %404 }
  0x8a   : > { %503 = vst.msk [vmem:[#allocation2 + $0x20] sm:$0xff] %vm500_vm1, %v409_v8  ;;  %501 = vst.msk [vmem:[#allocation2 + $0x10] sm:$0xff] %vm500_vm1, %v405_v9 }
  0x8d   : > { %v411_v11 = vpop.permute.xlu1 %410  ;;  %v407_v12 = vpop.permute.xlu0 %406 }
  0x8e   : > { %504 = vst.msk [vmem:[#allocation2 + $0x28] sm:$0xff] %vm500_vm1, %v411_v11  ;;  %502 = vst.msk [vmem:[#allocation2 + $0x18] sm:$0xff] %vm500_vm1, %v407_v12  ;;  %v710_v12 = vand.u32 15, %v554_v1  ;;  %v537_v1 = vadd.s32 24, %v3446_v7 }
  0x90   : > { %vm970_vm12 = vcmp.gt.s32.totalorder %v710_v12, 0  ;;  %v591_v12 = vand.u32 15, %v537_v1 }
  0x91   : > { %v415_v15 = vpop.permute.xlu1 %414  ;;  %v413_v16 = vpop.permute.xlu0 %412  ;;  %v1014_v17 = vld [vmem:[#allocation2 + $0xf] sm:$0xff] }
  0x92   : > { %506 = vst.msk [vmem:[#allocation2 + $0x38] sm:$0xff] %vm500_vm1, %v415_v15  ;;  %505 = vst.msk [vmem:[#allocation2 + $0x30] sm:$0xff] %vm500_vm1, %v413_v16  ;;  %v1110_v18 = vsel %vm950_vm2, %v1014_v17, 0.0  ;;  %vm978_vm2 = vcmp.gt.s32.totalorder %v766_v40, 0  ;;  %v647_v40 = vand.u32 15, %v545_v34 }
  0x93   : > { %1174 = vrot.lane.b32.xlu0 %v1110_v18, %s3254_s29 }
  0x95   : > { %v419_v21 = vpop.permute.xlu1 %418  ;;  %v417_v22 = vpop.permute.xlu0 %416  ;;  %v1015_v23 = vld [vmem:[#allocation2 + $0x17] sm:$0xff]  ;;  %v1016_v24 = vld [vmem:[#allocation2 + $0x1f] sm:$0xff]  ;;  %v1017_v30 = vld [vmem:[#allocation2 + $0x27] sm:$0xff] }
  0x96   : > { %508 = vst.msk [vmem:[#allocation2 + $0x48] sm:$0xff] %vm500_vm1, %v419_v21  ;;  %507 = vst.msk [vmem:[#allocation2 + $0x40] sm:$0xff] %vm500_vm1, %v417_v22  ;;  %1176 = vrot.lane.b32.xlu1 %v1015_v23, %s3254_s29  ;;  %v1112_v25 = vsel %vm952_vm3, %v1016_v24, 0.0  ;;  %vm980_vm3 = vcmp.gt.s32.totalorder %v780_v47, 0  ;;  %v661_v47 = vand.u32 15, %v547_v41 }
  0x97   : > { %1178 = vrot.lane.b32.xlu0 %v1112_v25, %s3254_s29 }
  0x99   : > { %v423_v28 = vpop.permute.xlu1 %422  ;;  %v421_v29 = vpop.permute.xlu0 %420  ;;  %v1018_v31 = vld [vmem:[#allocation2 + $0x2f] sm:$0xff]  ;;  %v1019_v37 = vld [vmem:[#allocation2 + $0x37] sm:$0xff] }
  0x9a   : > { %510 = vst.msk [vmem:[#allocation2 + $0x58] sm:$0xff] %vm500_vm1, %v423_v28  ;;  %509 = vst.msk [vmem:[#allocation2 + $0x50] sm:$0xff] %vm500_vm1, %v421_v29  ;;  %1180 = vrot.lane.b32.xlu1 %v1017_v30, %s3254_s29  ;;  %v1114_v32 = vsel %vm954_vm4, %v1018_v31, 0.0  ;;  %vm1727_vm4 = vcmask 1043456  }
  0x9b   : > { %1182 = vrot.lane.b32.xlu0 %v1114_v32, %s3254_s29 }
  0x9d   : > { %v427_v35 = vpop.permute.xlu1 %426  ;;  %v425_v36 = vpop.permute.xlu0 %424  ;;  %v1020_v38 = vld [vmem:[#allocation2 + $0x3f] sm:$0xff]  ;;  %v1021_v44 = vld [vmem:[#allocation2 + $0x47] sm:$0xff] }
  0x9e   : > { %512 = vst.msk [vmem:[#allocation2 + $0x68] sm:$0xff] %vm500_vm1, %v427_v35  ;;  %511 = vst.msk [vmem:[#allocation2 + $0x60] sm:$0xff] %vm500_vm1, %v425_v36  ;;  %1184 = vrot.lane.b32.xlu1 %v1019_v37, %s3254_s29  ;;  %v1116_v39 = vsel %vm956_vm5, %v1020_v38, 0.0  ;;  %vm3255_vm5 = vmmov 1  }
  0x9f   : > { %1186 = vrot.lane.b32.xlu0 %v1116_v39, %s3254_s29 }
  0xa1   : > { %v431_v42 = vpop.permute.xlu1 %430  ;;  %v429_v43 = vpop.permute.xlu0 %428  ;;  %v1022_v45 = vld [vmem:[#allocation2 + $0x4f] sm:$0xff]  ;;  %v1023_v51 = vld [vmem:[#allocation2 + $0x57] sm:$0xff] }
  0xa2   : > { %514 = vst.msk [vmem:[#allocation2 + $0x78] sm:$0xff] %vm500_vm1, %v431_v42  ;;  %513 = vst.msk [vmem:[#allocation2 + $0x70] sm:$0xff] %vm500_vm1, %v429_v43  ;;  %1188 = vrot.lane.b32.xlu1 %v1021_v44, %s3254_s29  ;;  %v1118_v46 = vsel %vm958_vm6, %v1022_v45, 0.0 }
  0xa3   : > { %1190 = vrot.lane.b32.xlu0 %v1118_v46, %s3254_s29  ;;  %vm3536_vm6 = vmpackc.low %vm1727_vm4, %vm3255_vm5 }
  0xa5   : > { %v435_v49 = vpop.permute.xlu1 %434  ;;  %v433_v50 = vpop.permute.xlu0 %432  ;;  %v1024_v52 = vld [vmem:[#allocation2 + $0x5f] sm:$0xff]  ;;  %v1025_v58 = vld [vmem:[#allocation2 + $0x67] sm:$0xff] }
  0xa6   : > { %516 = vst.msk [vmem:[#allocation2 + $0x88] sm:$0xff] %vm500_vm1, %v435_v49  ;;  %515 = vst.msk [vmem:[#allocation2 + $0x80] sm:$0xff] %vm500_vm1, %v433_v50  ;;  %1192 = vrot.lane.b32.xlu1 %v1023_v51, %s3254_s29  ;;  %v1120_v53 = vsel %vm960_vm7, %v1024_v52, 0.0 }
  0xa7   : > { %1194 = vrot.lane.b32.xlu0 %v1120_v53, %s3254_s29 }
  0xa9   : > { %v439_v56 = vpop.permute.xlu1 %438  ;;  %v437_v57 = vpop.permute.xlu0 %436  ;;  %v1026_v59 = vld [vmem:[#allocation2 + $0x6f] sm:$0xff]  ;;  %v1027_v3 = vld [vmem:[#allocation2 + $0x77] sm:$0xff] }
  0xaa   : > { %518 = vst.msk [vmem:[#allocation2 + $0x98] sm:$0xff] %vm500_vm1, %v439_v56  ;;  %517 = vst.msk [vmem:[#allocation2 + $0x90] sm:$0xff] %vm500_vm1, %v437_v57  ;;  %1196 = vrot.lane.b32.xlu1 %v1025_v58, %s3254_s29  ;;  %v1122_v60 = vsel %vm962_vm8, %v1026_v59, 0.0  ;;  %v1625_v56 = vld [vmem:[%s4004_s3 + $0x8] sm:$0xf]  ;;  %vm985_vm8 = vcmp.lt.s32.totalorder %v591_v12, 15 }
  0xab   : > { %1198 = vrot.lane.b32.xlu0 %v1122_v60, %s3254_s29  ;;  %v3534_v57 = vpack.c.bf16 %v1625_v56, %v1624_v55  ;;  %v535_v60 = vadd.s32 8, %v3446_v7  ;;  %v551_v55 = vadd.s32 136, %v3446_v7 }
  0xad   : > { %v443_v63 = vpop.permute.xlu1 %442  ;;  %v441_v0 = vpop.permute.xlu0 %440  ;;  %v1028_v4 = vld [vmem:[#allocation2 + $0x7f] sm:$0xff]  ;;  %v1029_v2 = vld [vmem:[#allocation2 + $0x87] sm:$0xff]  ;;  %3124 = vmatprep.subr.msk.bf16.mxu0 %vm3536_vm6, %v3534_v57  ;;  %v577_v6 = vand.u32 15, %v535_v60 }
  0xae   : > { %520 = vst.msk [vmem:[#allocation2 + $0xa8] sm:$0xff] %vm500_vm1, %v443_v63  ;;  %519 = vst.msk [vmem:[#allocation2 + $0xa0] sm:$0xff] %vm500_vm1, %v441_v0  ;;  %1200 = vrot.lane.b32.xlu1 %v1027_v3, %s3254_s29  ;;  %v1124_v5 = vsel %vm964_vm9, %v1028_v4, 0.0  ;;  %3127 = vmatpush3.bf16.msk.msra.mxu0 %vm3536_vm6, %v3534_v57  ;;  %v3116_v0 = vpack.c.bf16 %v2751_v62, %v2750_v61  ;;  %v1592_v3 = vld [vmem:[#allocation2] sm:$0xff]  ;;  %vm987_vm9 = vcmp.lt.s32.totalorder %v605_v19, 15 }
  0xaf   : > { %1202 = vrot.lane.b32.xlu0 %v1124_v5, %s3254_s29  ;;  %3016 = vmatprep.mubr.msk.f32.mxu0 %vm367_vm0, %v1592_v3  ;;  %v1593_v5 = vld [vmem:[#allocation2 + $0x8] sm:$0xff]  ;;  %vm983_vm7 = vcmp.lt.s32.totalorder %v577_v6, 15 }
  0xb0   : > { %3118 = vmatprep.subr.msk.bf16.mxu1 %vm3536_vm6, %v3116_v0 }
  0xb1   : > { %v447_v8 = vpop.permute.xlu1 %446  ;;  %v445_v9 = vpop.permute.xlu0 %444  ;;  %v1030_v10 = vld [vmem:[#allocation2 + $0x8f] sm:$0xff]  ;;  %v1031_v16 = vld [vmem:[#allocation2 + $0x97] sm:$0xff]  ;;  %3017 = vmatmul.mubr.msk.f32.vlgmr.msra.gmra.mrb[0].mxu0 %vm367_vm0, %v1593_v5  ;;  %3121 = vmatpush3.bf16.msk.msra.mxu1 %vm3536_vm6, %v3116_v0  ;;  %v553_v0 = vadd.s32 152, %v3446_v7 }
  0xb2   : > { %522 = vst.msk [vmem:[#allocation2 + $0xb8] sm:$0xff] %vm500_vm1, %v447_v8  ;;  %521 = vst.msk [vmem:[#allocation2 + $0xb0] sm:$0xff] %vm500_vm1, %v445_v9  ;;  %1204 = vrot.lane.b32.xlu1 %v1029_v2, %s3254_s29  ;;  %v1126_v11 = vsel %vm966_vm10, %v1030_v10, 0.0  ;;  %3134 = vmatprep.subr.msk.bf16.mxu1 %vm3536_vm6, %v3534_v57  ;;  %v2818_v9 = vld [vmem:[%s4004_s3 + $0x20] sm:$0xff]  ;;  %v2819_v2 = vld [vmem:[%s4004_s3 + $0x28] sm:$0xf] }
  0xb3   : > { %1206 = vrot.lane.b32.xlu0 %v1126_v11, %s3254_s29  ;;  %v3128_v11 = vpack.c.bf16 %v2819_v2, %v2818_v9  ;;  %vm989_vm10 = vcmp.lt.s32.totalorder %v619_v26, 15  ;;  %v555_v9 = vadd.s32 168, %v3446_v7 }
  0xb5   : > { %v451_v14 = vpop.permute.xlu1 %450  ;;  %v449_v15 = vpop.permute.xlu0 %448  ;;  %v1032_v17 = vld [vmem:[#allocation2 + $0x9f] sm:$0xff]  ;;  %v1033_v23 = vld [vmem:[#allocation2 + $0xa7] sm:$0xff]  ;;  %3130 = vmatprep.subr.msk.bf16.mxu0 %vm3536_vm6, %v3128_v11 }
  0xb6   : > { %524 = vst.msk [vmem:[#allocation2 + $0xc8] sm:$0xff] %vm500_vm1, %v451_v14  ;;  %523 = vst.msk [vmem:[#allocation2 + $0xc0] sm:$0xff] %vm500_vm1, %v449_v15  ;;  %1208 = vrot.lane.b32.xlu1 %v1031_v16, %s3254_s29  ;;  %v1128_v18 = vsel %vm968_vm11, %v1032_v17, 0.0  ;;  %3133 = vmatpush3.bf16.msk.msra.mxu0 %vm3536_vm6, %v3128_v11  ;;  %vm991_vm11 = vcmp.lt.s32.totalorder %v633_v33, 15 }
  0xb7   : > { %1210 = vrot.lane.b32.xlu0 %v1128_v18, %s3254_s29 }
  0xb9   : > { %v455_v21 = vpop.permute.xlu1 %454  ;;  %v453_v22 = vpop.permute.xlu0 %452  ;;  %v1034_v24 = vld [vmem:[#allocation2 + $0xaf] sm:$0xff]  ;;  %v1035_v30 = vld [vmem:[#allocation2 + $0xb7] sm:$0xff] }
  0xba   : > { %526 = vst.msk [vmem:[#allocation2 + $0xd8] sm:$0xff] %vm500_vm1, %v455_v21  ;;  %525 = vst.msk [vmem:[#allocation2 + $0xd0] sm:$0xff] %vm500_vm1, %v453_v22  ;;  %1212 = vrot.lane.b32.xlu1 %v1033_v23, %s3254_s29  ;;  %v1130_v25 = vsel %vm970_vm12, %v1034_v24, 0.0  ;;  %vm993_vm12 = vcmp.lt.s32.totalorder %v647_v40, 15 }
  0xbb   : > { %1214 = vrot.lane.b32.xlu0 %v1130_v25, %s3254_s29 }
  0xbd   : > { %v459_v28 = vpop.permute.xlu1 %458  ;;  %v457_v29 = vpop.permute.xlu0 %456  ;;  %v1036_v31 = vld [vmem:[#allocation2 + $0xbf] sm:$0xff]  ;;  %v1037_v37 = vld [vmem:[#allocation2 + $0xc7] sm:$0xff] }
  0xbe   : > { %528 = vst.msk [vmem:[#allocation2 + $0xe8] sm:$0xff] %vm500_vm1, %v459_v28  ;;  %527 = vst.msk [vmem:[#allocation2 + $0xe0] sm:$0xff] %vm500_vm1, %v457_v29  ;;  %1216 = vrot.lane.b32.xlu1 %v1035_v30, %s3254_s29  ;;  %v1132_v32 = vsel %vm972_vm13, %v1036_v31, 0.0  ;;  %vm995_vm13 = vcmp.lt.s32.totalorder %v661_v47, 15 }
  0xbf   : > { %1218 = vrot.lane.b32.xlu0 %v1132_v32, %s3254_s29 }
  0xc1   : > { %v463_v35 = vpop.permute.xlu1 %462  ;;  %v461_v36 = vpop.permute.xlu0 %460  ;;  %v1038_v38 = vld [vmem:[#allocation2 + $0xcf] sm:$0xff]  ;;  %v1039_v44 = vld [vmem:[#allocation2 + $0xd7] sm:$0xff] }
  0xc2   : > { %530 = vst.msk [vmem:[#allocation2 + $0xf8] sm:$0xff] %vm500_vm1, %v463_v35  ;;  %529 = vst.msk [vmem:[#allocation2 + $0xf0] sm:$0xff] %vm500_vm1, %v461_v36  ;;  %1220 = vrot.lane.b32.xlu1 %v1037_v37, %s3254_s29  ;;  %v1134_v39 = vsel %vm974_vm14, %v1038_v38, 0.0 }
  0xc3   : > { %1222 = vrot.lane.b32.xlu0 %v1134_v39, %s3254_s29 }
  0xc5   : > { %v467_v42 = vpop.permute.xlu1 %466  ;;  %v465_v43 = vpop.permute.xlu0 %464  ;;  %v1040_v45 = vld [vmem:[#allocation2 + $0xdf] sm:$0xff]  ;;  %v1041_v48 = vld [vmem:[#allocation2 + $0xe7] sm:$0xff] }
  0xc6   : > { %532 = vst.msk [vmem:[#allocation2 + $0x108] sm:$0xff] %vm500_vm1, %v467_v42  ;;  %531 = vst.msk [vmem:[#allocation2 + $0x100] sm:$0xff] %vm500_vm1, %v465_v43  ;;  %1224 = vrot.lane.b32.xlu1 %v1039_v44, %s3254_s29  ;;  %v1136_v46 = vsel %vm976_vm15, %v1040_v45, 0.0  ;;  %vm1270_vm1 = vcmask 31744  }
  0xc7   : > { %1226 = vrot.lane.b32.xlu0 %v1136_v46, %s3254_s29 }
  0xc9   : > { %v1042_v49 = vld [vmem:[#allocation2 + $0xef] sm:$0xff]  ;;  %v1043_v51 = vld [vmem:[#allocation2 + $0xf7] sm:$0xff] }
  0xca   : > { %1228 = vrot.lane.b32.xlu1 %v1041_v48, %s3254_s29  ;;  %v1138_v50 = vsel %vm978_vm2, %v1042_v49, 0.0  ;;  %v549_v48 = vadd.s32 120, %v3446_v7 }
  0xcb   : > { %1230 = vrot.lane.b32.xlu0 %v1138_v50, %s3254_s29 }
  0xcd   : > { %v1044_v52 = vld [vmem:[#allocation2 + $0xff] sm:$0xff]  ;;  %v1045_v54 = vld [vmem:[#allocation2 + $0x107] sm:$0xff] }
  0xce   : > { %1232 = vrot.lane.b32.xlu1 %v1043_v51, %s3254_s29  ;;  %v1140_v53 = vsel %vm980_vm3, %v1044_v52, 0.0 }
  0xcf   : > { %1234 = vrot.lane.b32.xlu0 %v1140_v53, %s3254_s29 }
  0xd2   : > { %1236 = vrot.lane.b32.xlu1 %v1045_v54, %s3254_s29  ;;  %v675_v54 = vand.u32 15, %v549_v48 }
  0xd4   : > { %vm997_vm14 = vcmp.lt.s32.totalorder %v675_v54, 15 }
 0x105   : > { %v1175_v58 = vpop.permute.xlu0 %1174 }
 0x106   : > { %1271 = vst.msk [vmem:[#allocation2 + $0x10] sm:$0xff] %vm1270_vm1, %v1175_v58 }
 0x108   : > { %v1177_v63 = vpop.permute.xlu1 %1176 }
 0x109   : > { %1272 = vst.msk [vmem:[#allocation2 + $0x18] sm:$0xff] %vm1270_vm1, %v1177_v63  ;;  %v1179_v4 = vpop.permute.xlu0 %1178  ;;  %v689_v63 = vand.u32 15, %v551_v55 }
 0x10a   : > { %1273 = vst.msk [vmem:[#allocation2 + $0x20] sm:$0xff] %vm1270_vm1, %v1179_v4 }
 0x10b   : > { %vm999_vm15 = vcmp.lt.s32.totalorder %v689_v63, 15 }
 0x10c   : > { %v1181_v8 = vpop.permute.xlu1 %1180 }
 0x10d   : > { %1274 = vst.msk [vmem:[#allocation2 + $0x28] sm:$0xff] %vm1270_vm1, %v1181_v8  ;;  %v1183_v10 = vpop.permute.xlu0 %1182  ;;  %v703_v8 = vand.u32 15, %v553_v0 }
 0x10e   : > { %1275 = vst.msk [vmem:[#allocation2 + $0x30] sm:$0xff] %vm1270_vm1, %v1183_v10 }
 0x10f   : > { %vm1001_vm2 = vcmp.lt.s32.totalorder %v703_v8, 15 }
 0x110   : > { %v1185_v14 = vpop.permute.xlu1 %1184  ;;  %v1303_v15 = vld [vmem:[#allocation2 + $0x11] sm:$0xff] }
 0x111   : > { %1276 = vst.msk [vmem:[#allocation2 + $0x38] sm:$0xff] %vm1270_vm1, %v1185_v14  ;;  %1463 = vrot.lane.b32.xlu0 %v1303_v15, %s3253_s28  ;;  %v1187_v16 = vpop.permute.xlu0 %1186  ;;  %v1304_v17 = vld [vmem:[#allocation2 + $0x19] sm:$0xff]  ;;  %v717_v14 = vand.u32 15, %v555_v9  ;;  %v557_v15 = vadd.s32 184, %v3446_v7 }
 0x112   : > { %1277 = vst.msk [vmem:[#allocation2 + $0x40] sm:$0xff] %vm1270_vm1, %v1187_v16  ;;  %v1400_v18 = vsel %vm983_vm7, %v1304_v17, 0.0 }
 0x113   : > { %1465 = vrot.lane.b32.xlu1 %v1400_v18, %s3253_s28  ;;  %vm1003_vm3 = vcmp.lt.s32.totalorder %v717_v14, 15 }
 0x114   : > { %v1189_v21 = vpop.permute.xlu1 %1188  ;;  %v1305_v22 = vld [vmem:[#allocation2 + $0x21] sm:$0xff] }
 0x115   : > { %1278 = vst.msk [vmem:[#allocation2 + $0x48] sm:$0xff] %vm1270_vm1, %v1189_v21  ;;  %1467 = vrot.lane.b32.xlu0 %v1305_v22, %s3253_s28  ;;  %v1191_v23 = vpop.permute.xlu0 %1190  ;;  %v1306_v24 = vld [vmem:[#allocation2 + $0x29] sm:$0xff]  ;;  %v731_v21 = vand.u32 15, %v557_v15  ;;  %v559_v22 = vadd.s32 200, %v3446_v7 }
 0x116   : > { %1279 = vst.msk [vmem:[#allocation2 + $0x50] sm:$0xff] %vm1270_vm1, %v1191_v23  ;;  %v1402_v25 = vsel %vm985_vm8, %v1306_v24, 0.0 }
 0x117   : > { %1469 = vrot.lane.b32.xlu1 %v1402_v25, %s3253_s28  ;;  %vm1005_vm4 = vcmp.lt.s32.totalorder %v731_v21, 15 }
 0x118   : > { %v1193_v28 = vpop.permute.xlu1 %1192  ;;  %v1307_v29 = vld [vmem:[#allocation2 + $0x31] sm:$0xff] }
 0x119   : > { %1280 = vst.msk [vmem:[#allocation2 + $0x58] sm:$0xff] %vm1270_vm1, %v1193_v28  ;;  %1471 = vrot.lane.b32.xlu0 %v1307_v29, %s3253_s28  ;;  %v1195_v30 = vpop.permute.xlu0 %1194  ;;  %v1308_v31 = vld [vmem:[#allocation2 + $0x39] sm:$0xff]  ;;  %v745_v28 = vand.u32 15, %v559_v22  ;;  %v561_v29 = vadd.s32 216, %v3446_v7 }
 0x11a   : > { %1281 = vst.msk [vmem:[#allocation2 + $0x60] sm:$0xff] %vm1270_vm1, %v1195_v30  ;;  %v1404_v32 = vsel %vm987_vm9, %v1308_v31, 0.0 }
 0x11b   : > { %1473 = vrot.lane.b32.xlu1 %v1404_v32, %s3253_s28  ;;  %vm1007_vm5 = vcmp.lt.s32.totalorder %v745_v28, 15 }
 0x11c   : > { %v1197_v35 = vpop.permute.xlu1 %1196  ;;  %v1309_v36 = vld [vmem:[#allocation2 + $0x41] sm:$0xff] }
 0x11d   : > { %1282 = vst.msk [vmem:[#allocation2 + $0x68] sm:$0xff] %vm1270_vm1, %v1197_v35  ;;  %1475 = vrot.lane.b32.xlu0 %v1309_v36, %s3253_s28  ;;  %v1199_v37 = vpop.permute.xlu0 %1198  ;;  %v1310_v38 = vld [vmem:[#allocation2 + $0x49] sm:$0xff]  ;;  %v759_v35 = vand.u32 15, %v561_v29  ;;  %v563_v36 = vadd.s32 232, %v3446_v7 }
 0x11e   : > { %1283 = vst.msk [vmem:[#allocation2 + $0x70] sm:$0xff] %vm1270_vm1, %v1199_v37  ;;  %v1406_v39 = vsel %vm989_vm10, %v1310_v38, 0.0  ;;  %vm1559_vm10 = vcmask 97344  }
 0x11f   : > { %1477 = vrot.lane.b32.xlu1 %v1406_v39, %s3253_s28  ;;  %vm1009_vm7 = vcmp.lt.s32.totalorder %v759_v35, 15 }
 0x120   : > { %v1201_v42 = vpop.permute.xlu1 %1200  ;;  %v1311_v43 = vld [vmem:[#allocation2 + $0x51] sm:$0xff] }
 0x121   : > { %1284 = vst.msk [vmem:[#allocation2 + $0x78] sm:$0xff] %vm1270_vm1, %v1201_v42  ;;  %1479 = vrot.lane.b32.xlu0 %v1311_v43, %s3253_s28  ;;  %v1203_v44 = vpop.permute.xlu0 %1202  ;;  %v1312_v45 = vld [vmem:[#allocation2 + $0x59] sm:$0xff]  ;;  %v565_v42 = vadd.s32 248, %v3446_v7  ;;  %v773_v43 = vand.u32 15, %v563_v36 }
 0x122   : > { %1285 = vst.msk [vmem:[#allocation2 + $0x80] sm:$0xff] %vm1270_vm1, %v1203_v44  ;;  %v1408_v46 = vsel %vm991_vm11, %v1312_v45, 0.0 }
 0x123   : > { %1481 = vrot.lane.b32.xlu1 %v1408_v46, %s3253_s28  ;;  %v787_v48 = vand.u32 15, %v565_v42  ;;  %vm1011_vm8 = vcmp.lt.s32.totalorder %v773_v43, 15 }
 0x124   : > { %v1205_v49 = vpop.permute.xlu1 %1204  ;;  %v1313_v50 = vld [vmem:[#allocation2 + $0x61] sm:$0xff] }
 0x125   : > { %1286 = vst.msk [vmem:[#allocation2 + $0x88] sm:$0xff] %vm1270_vm1, %v1205_v49  ;;  %1483 = vrot.lane.b32.xlu0 %v1313_v50, %s3253_s28  ;;  %v1207_v51 = vpop.permute.xlu0 %1206  ;;  %v1314_v52 = vld [vmem:[#allocation2 + $0x69] sm:$0xff]  ;;  %vm1013_vm9 = vcmp.lt.s32.totalorder %v787_v48, 15 }
 0x126   : > { %1287 = vst.msk [vmem:[#allocation2 + $0x90] sm:$0xff] %vm1270_vm1, %v1207_v51  ;;  %v1410_v53 = vsel %vm993_vm12, %v1314_v52, 0.0 }
 0x127   : > { %1485 = vrot.lane.b32.xlu1 %v1410_v53, %s3253_s28 }
 0x128   : > { %v1209_v56 = vpop.permute.xlu1 %1208  ;;  %v1315_v58 = vld [vmem:[#allocation2 + $0x71] sm:$0xff] }
 0x129   : > { %1288 = vst.msk [vmem:[#allocation2 + $0x98] sm:$0xff] %vm1270_vm1, %v1209_v56  ;;  %1487 = vrot.lane.b32.xlu0 %v1315_v58, %s3253_s28  ;;  %v1211_v60 = vpop.permute.xlu0 %1210  ;;  %v1316_v61 = vld [vmem:[#allocation2 + $0x79] sm:$0xff] }
 0x12a   : > { %1289 = vst.msk [vmem:[#allocation2 + $0xa0] sm:$0xff] %vm1270_vm1, %v1211_v60  ;;  %v1412_v62 = vsel %vm995_vm13, %v1316_v61, 0.0 }
 0x12b   : > { %1489 = vrot.lane.b32.xlu1 %v1412_v62, %s3253_s28 }
 0x12c   : > { %v1213_v3 = vpop.permute.xlu1 %1212  ;;  %v1317_v4 = vld [vmem:[#allocation2 + $0x81] sm:$0xff] }
 0x12d   : > { %1290 = vst.msk [vmem:[#allocation2 + $0xa8] sm:$0xff] %vm1270_vm1, %v1213_v3  ;;  %1491 = vrot.lane.b32.xlu0 %v1317_v4, %s3253_s28  ;;  %v1215_v5 = vpop.permute.xlu0 %1214  ;;  %v1318_v6 = vld [vmem:[#allocation2 + $0x89] sm:$0xff] }
 0x12e   : > { %1291 = vst.msk [vmem:[#allocation2 + $0xb0] sm:$0xff] %vm1270_vm1, %v1215_v5  ;;  %v1414_v1 = vsel %vm997_vm14, %v1318_v6, 0.0 }
 0x12f   : > { %1493 = vrot.lane.b32.xlu1 %v1414_v1, %s3253_s28 }
 0x130   : > { %v1217_v2 = vpop.permute.xlu1 %1216  ;;  %v1319_v10 = vld [vmem:[#allocation2 + $0x91] sm:$0xff] }
 0x131   : > { %1292 = vst.msk [vmem:[#allocation2 + $0xb8] sm:$0xff] %vm1270_vm1, %v1217_v2  ;;  %1495 = vrot.lane.b32.xlu0 %v1319_v10, %s3253_s28  ;;  %v1219_v11 = vpop.permute.xlu0 %1218  ;;  %v1320_v12 = vld [vmem:[#allocation2 + $0x99] sm:$0xff] }
 0x132   : > { %1293 = vst.msk [vmem:[#allocation2 + $0xc0] sm:$0xff] %vm1270_vm1, %v1219_v11  ;;  %v1416_v13 = vsel %vm999_vm15, %v1320_v12, 0.0 }
 0x133   : > { %1497 = vrot.lane.b32.xlu1 %v1416_v13, %s3253_s28 }
 0x134   : > { %v1221_v16 = vpop.permute.xlu1 %1220  ;;  %v1321_v17 = vld [vmem:[#allocation2 + $0xa1] sm:$0xff] }
 0x135   : > { %1294 = vst.msk [vmem:[#allocation2 + $0xc8] sm:$0xff] %vm1270_vm1, %v1221_v16  ;;  %1499 = vrot.lane.b32.xlu0 %v1321_v17, %s3253_s28  ;;  %v1223_v18 = vpop.permute.xlu0 %1222  ;;  %v1322_v19 = vld [vmem:[#allocation2 + $0xa9] sm:$0xff] }
 0x136   : > { %1295 = vst.msk [vmem:[#allocation2 + $0xd0] sm:$0xff] %vm1270_vm1, %v1223_v18  ;;  %v1418_v20 = vsel %vm1001_vm2, %v1322_v19, 0.0 }
 0x137   : > { %1501 = vrot.lane.b32.xlu1 %v1418_v20, %s3253_s28 }
 0x138   : > { %v1225_v23 = vpop.permute.xlu1 %1224  ;;  %v1323_v24 = vld [vmem:[#allocation2 + $0xb1] sm:$0xff] }
 0x139   : > { %1296 = vst.msk [vmem:[#allocation2 + $0xd8] sm:$0xff] %vm1270_vm1, %v1225_v23  ;;  %1503 = vrot.lane.b32.xlu0 %v1323_v24, %s3253_s28  ;;  %v1227_v25 = vpop.permute.xlu0 %1226  ;;  %v1324_v26 = vld [vmem:[#allocation2 + $0xb9] sm:$0xff] }
 0x13a   : > { %1297 = vst.msk [vmem:[#allocation2 + $0xe0] sm:$0xff] %vm1270_vm1, %v1227_v25  ;;  %v1420_v27 = vsel %vm1003_vm3, %v1324_v26, 0.0 }
 0x13b   : > { %1505 = vrot.lane.b32.xlu1 %v1420_v27, %s3253_s28 }
 0x13c   : > { %v1229_v30 = vpop.permute.xlu1 %1228  ;;  %v1325_v31 = vld [vmem:[#allocation2 + $0xc1] sm:$0xff] }
 0x13d   : > { %1298 = vst.msk [vmem:[#allocation2 + $0xe8] sm:$0xff] %vm1270_vm1, %v1229_v30  ;;  %1507 = vrot.lane.b32.xlu0 %v1325_v31, %s3253_s28  ;;  %v1231_v32 = vpop.permute.xlu0 %1230  ;;  %v1326_v33 = vld [vmem:[#allocation2 + $0xc9] sm:$0xff] }
 0x13e   : > { %1299 = vst.msk [vmem:[#allocation2 + $0xf0] sm:$0xff] %vm1270_vm1, %v1231_v32  ;;  %v1422_v34 = vsel %vm1005_vm4, %v1326_v33, 0.0 }
 0x13f   : > { %1509 = vrot.lane.b32.xlu1 %v1422_v34, %s3253_s28 }
 0x140   : > { %v1233_v37 = vpop.permute.xlu1 %1232  ;;  %v1327_v38 = vld [vmem:[#allocation2 + $0xd1] sm:$0xff] }
 0x141   : > { %1300 = vst.msk [vmem:[#allocation2 + $0xf8] sm:$0xff] %vm1270_vm1, %v1233_v37  ;;  %1511 = vrot.lane.b32.xlu0 %v1327_v38, %s3253_s28  ;;  %v1235_v39 = vpop.permute.xlu0 %1234  ;;  %v1328_v40 = vld [vmem:[#allocation2 + $0xd9] sm:$0xff] }
 0x142   : > { %1301 = vst.msk [vmem:[#allocation2 + $0x100] sm:$0xff] %vm1270_vm1, %v1235_v39  ;;  %v1424_v41 = vsel %vm1007_vm5, %v1328_v40, 0.0 }
 0x143   : > { %1513 = vrot.lane.b32.xlu1 %v1424_v41, %s3253_s28 }
 0x144   : > { %v1237_v44 = vpop.permute.xlu1 %1236  ;;  %v1329_v45 = vld [vmem:[#allocation2 + $0xe1] sm:$0xff] }
 0x145   : > { %1302 = vst.msk [vmem:[#allocation2 + $0x108] sm:$0xff] %vm1270_vm1, %v1237_v44  ;;  %1515 = vrot.lane.b32.xlu0 %v1329_v45, %s3253_s28  ;;  %v1330_v46 = vld [vmem:[#allocation2 + $0xe9] sm:$0xff] }
 0x146   : > { %v1426_v47 = vsel %vm1009_vm7, %v1330_v46, 0.0 }
 0x147   : > { %1517 = vrot.lane.b32.xlu1 %v1426_v47, %s3253_s28 }
 0x148   : > { %v1331_v49 = vld [vmem:[#allocation2 + $0xf1] sm:$0xff] }
 0x149   : > { %1519 = vrot.lane.b32.xlu0 %v1331_v49, %s3253_s28  ;;  %v1332_v7 = vld [vmem:[#allocation2 + $0xf9] sm:$0xff] }
 0x14a   : > { %v1428_v50 = vsel %vm1011_vm8, %v1332_v7, 0.0 }
 0x14b   : > { %1521 = vrot.lane.b32.xlu1 %v1428_v50, %s3253_s28 }
 0x14c   : > { %v1333_v51 = vld [vmem:[#allocation2 + $0x101] sm:$0xff]  ;;  %v1334_v52 = vld [vmem:[#allocation2 + $0x109] sm:$0xff] }
 0x14d   : > { %1523 = vrot.lane.b32.xlu0 %v1333_v51, %s3253_s28  ;;  %v1430_v53 = vsel %vm1013_vm9, %v1334_v52, 0.0 }
 0x14f   : > { %1525 = vrot.lane.b32.xlu1 %v1430_v53, %s3253_s28 }
 0x183   : > { %v1464_v54 = vpop.permute.xlu0 %1463 }
 0x184   : > { %1560 = vst.msk [vmem:[#allocation2 + $0x10] sm:$0xff] %vm1559_vm10, %v1464_v54  ;;  %v2220_v54 = vld [vmem:[#allocation2 + $0x110] sm:$0xff] }
 0x185   : > { %v1466_v55 = vpop.permute.xlu1 %1465 }
 0x186   : > { %1561 = vst.msk [vmem:[#allocation2 + $0x18] sm:$0xff] %vm1559_vm10, %v1466_v55  ;;  %v2221_v55 = vld [vmem:[#allocation2 + $0x118] sm:$0xff] }
 0x187   : > { %v1468_v56 = vpop.permute.xlu0 %1467 }
 0x188   : > { %1562 = vst.msk [vmem:[#allocation2 + $0x20] sm:$0xff] %vm1559_vm10, %v1468_v56 }
 0x189   : > { %v1470_v58 = vpop.permute.xlu1 %1469 }
 0x18a   : > { %1563 = vst.msk [vmem:[#allocation2 + $0x28] sm:$0xff] %vm1559_vm10, %v1470_v58 }
 0x18b   : > { %v1472_v60 = vpop.permute.xlu0 %1471  ;;  %v1594_v61 = vld [vmem:[#allocation2 + $0x10] sm:$0xff] }
 0x18c   : > { %1564 = vst.msk [vmem:[#allocation2 + $0x30] sm:$0xff] %vm1559_vm10, %v1472_v60  ;;  %2964 = vmatprep.mubr.msk.f32.mxu1 %vm367_vm0, %v1594_v61  ;;  %3019 = vmatprep.mubr.msk.f32.mxu0 %vm367_vm0, %v1594_v61 }
 0x18d   : > { %v1474_v62 = vpop.permute.xlu1 %1473  ;;  %v1595_v63 = vld [vmem:[#allocation2 + $0x18] sm:$0xff] }
 0x18e   : > { %1565 = vst.msk [vmem:[#allocation2 + $0x38] sm:$0xff] %vm1559_vm10, %v1474_v62  ;;  %2965 = vmatmul.mubr.msk.f32.vlgmr.msra.gmra.mrb[0].mxu1 %vm367_vm0, %v1595_v63  ;;  %3020 = vmatmul.mubr.msk.f32.gmra.mrb[2].mxu0 %vm367_vm0, %v1595_v63 }
 0x18f   : > { %3135 = vmatpush3.bf16.msk.msra.mxu1 %vm3536_vm6, %v3534_v57  ;;  %v1476_v0 = vpop.permute.xlu0 %1475  ;;  %v1596_v3 = vld [vmem:[#allocation2 + $0x20] sm:$0xff] }
 0x190   : > { %1566 = vst.msk [vmem:[#allocation2 + $0x40] sm:$0xff] %vm1559_vm10, %v1476_v0  ;;  %2967 = vmatprep.mubr.msk.f32.mxu1 %vm367_vm0, %v1596_v3  ;;  %3022 = vmatprep.mubr.msk.f32.mxu0 %vm367_vm0, %v1596_v3 }
 0x191   : > { %v1478_v4 = vpop.permute.xlu1 %1477  ;;  %v3667_v5 = vld [vmem:[#allocation2 + $0x28] sm:$0xff] }
 0x192   : > { %1567 = vst.msk [vmem:[#allocation2 + $0x48] sm:$0xff] %vm1559_vm10, %v1478_v4  ;;  %2968 = vmatmul.mubr.msk.f32.gmra.mrb[2].mxu1 %vm367_vm0, %v3667_v5  ;;  %3023 = vmatmul.mubr.msk.f32.gmra.mrb[4].mxu0 %vm367_vm0, %v3667_v5 }
 0x193   : > { %v1480_v57 = vpop.permute.xlu0 %1479  ;;  %v1598_v59 = vld [vmem:[#allocation2 + $0x30] sm:$0xff] }
 0x194   : > { %1568 = vst.msk [vmem:[#allocation2 + $0x50] sm:$0xff] %vm1559_vm10, %v1480_v57  ;;  %2970 = vmatprep.mubr.msk.f32.mxu1 %vm367_vm0, %v1598_v59  ;;  %3025 = vmatprep.mubr.msk.f32.mxu0 %vm367_vm0, %v1598_v59 }
 0x195   : > { %v1482_v6 = vpop.permute.xlu1 %1481  ;;  %v3677_v1 = vld [vmem:[#allocation2 + $0x38] sm:$0xff] }
 0x196   : > { %1569 = vst.msk [vmem:[#allocation2 + $0x58] sm:$0xff] %vm1559_vm10, %v1482_v6  ;;  %2971 = vmatmul.mubr.msk.f32.gmra.mrb[4].mxu1 %vm367_vm0, %v3677_v1  ;;  %3026 = vmatmul.mubr.msk.f32.gmra.mrb[6].mxu0 %vm367_vm0, %v3677_v1 }
 0x197   : > { %v1484_v8 = vpop.permute.xlu0 %1483  ;;  %v1600_v9 = vld [vmem:[#allocation2 + $0x40] sm:$0xff] }
 0x198   : > { %1570 = vst.msk [vmem:[#allocation2 + $0x60] sm:$0xff] %vm1559_vm10, %v1484_v8  ;;  %2973 = vmatprep.mubr.msk.f32.mxu1 %vm367_vm0, %v1600_v9  ;;  %3028 = vmatprep.mubr.msk.f32.mxu0 %vm367_vm0, %v1600_v9 }
 0x199   : > { %v1486_v2 = vpop.permute.xlu1 %1485  ;;  %v3687_v10 = vld [vmem:[#allocation2 + $0x48] sm:$0xff] }
 0x19a   : > { %1571 = vst.msk [vmem:[#allocation2 + $0x68] sm:$0xff] %vm1559_vm10, %v1486_v2  ;;  %2974 = vmatmul.mubr.msk.f32.gmra.mrb[6].mxu1 %vm367_vm0, %v3687_v10  ;;  %3029 = vmatmul.mubr.msk.f32.gmra.mrb[8].mxu0 %vm367_vm0, %v3687_v10  ;;  %v3853_v2 = vld [vmem:[%s4005_s4] ss:$0 sm:$0xff] }
 0x19b   : > { %v1488_v11 = vpop.permute.xlu0 %1487  ;;  %v1602_v12 = vld [vmem:[#allocation2 + $0x50] sm:$0xff] }
 0x19c   : > { %1572 = vst.msk [vmem:[#allocation2 + $0x70] sm:$0xff] %vm1559_vm10, %v1488_v11  ;;  %2976 = vmatprep.mubr.msk.f32.mxu1 %vm367_vm0, %v1602_v12  ;;  %3031 = vmatprep.mubr.msk.f32.mxu0 %vm367_vm0, %v1602_v12 }
 0x19d   : > { %v1490_v13 = vpop.permute.xlu1 %1489  ;;  %v3697_v14 = vld [vmem:[#allocation2 + $0x58] sm:$0xff] }
 0x19e   : > { %1573 = vst.msk [vmem:[#allocation2 + $0x78] sm:$0xff] %vm1559_vm10, %v1490_v13  ;;  %2977 = vmatmul.mubr.msk.f32.gmra.mrb[8].mxu1 %vm367_vm0, %v3697_v14  ;;  %3032 = vmatmul.mubr.msk.f32.gmra.mrb[10].mxu0 %vm367_vm0, %v3697_v14 }
 0x19f   : > { %v1492_v15 = vpop.permute.xlu0 %1491  ;;  %v1604_v16 = vld [vmem:[#allocation2 + $0x60] sm:$0xff] }
 0x1a0   : > { %1574 = vst.msk [vmem:[#allocation2 + $0x80] sm:$0xff] %vm1559_vm10, %v1492_v15  ;;  %2979 = vmatprep.mubr.msk.f32.mxu1 %vm367_vm0, %v1604_v16  ;;  %3034 = vmatprep.mubr.msk.f32.mxu0 %vm367_vm0, %v1604_v16 }
 0x1a1   : > { %v1494_v17 = vpop.permute.xlu1 %1493  ;;  %v3707_v18 = vld [vmem:[#allocation2 + $0x68] sm:$0xff] }
 0x1a2   : > { %1575 = vst.msk [vmem:[#allocation2 + $0x88] sm:$0xff] %vm1559_vm10, %v1494_v17  ;;  %2980 = vmatmul.mubr.msk.f32.gmra.mrb[10].mxu1 %vm367_vm0, %v3707_v18  ;;  %3035 = vmatmul.mubr.msk.f32.gmra.mrb[12].mxu0 %vm367_vm0, %v3707_v18  ;;  %v3212_v17 = vld [vmem:[%s3311_s25 + $0x8] sm:$0xff] }
 0x1a3   : > { %v1496_v19 = vpop.permute.xlu0 %1495  ;;  %v1606_v20 = vld [vmem:[#allocation2 + $0x70] sm:$0xff] }
 0x1a4   : > { %1576 = vst.msk [vmem:[#allocation2 + $0x90] sm:$0xff] %vm1559_vm10, %v1496_v19  ;;  %2982 = vmatprep.mubr.msk.f32.mxu1 %vm367_vm0, %v1606_v20  ;;  %3037 = vmatprep.mubr.msk.f32.mxu0 %vm367_vm0, %v1606_v20 }
 0x1a5   : > { %v1498_v21 = vpop.permute.xlu1 %1497  ;;  %v3717_v22 = vld [vmem:[#allocation2 + $0x78] sm:$0xff] }
 0x1a6   : > { %1577 = vst.msk [vmem:[#allocation2 + $0x98] sm:$0xff] %vm1559_vm10, %v1498_v21  ;;  %2983 = vmatmul.mubr.msk.f32.gmra.mrb[12].mxu1 %vm367_vm0, %v3717_v22  ;;  %3038 = vmatmul.mubr.msk.f32.gmra.mrb[14].mxu0 %vm367_vm0, %v3717_v22  ;;  %v3213_v21 = vld [vmem:[%s3311_s25] sm:$0xff] }
 0x1a7   : > { %3068 = vmatprep.mubr.msk.f32.mxu0 %vm367_vm0, %v1596_v3  ;;  %v1500_v23 = vpop.permute.xlu0 %1499  ;;  %v3725_v24 = vld [vmem:[#allocation2 + $0x80] sm:$0xff] }
 0x1a8   : > { %1578 = vst.msk [vmem:[#allocation2 + $0xa0] sm:$0xff] %vm1559_vm10, %v1500_v23  ;;  %2985 = vmatprep.mubr.msk.f32.mxu1 %vm367_vm0, %v3725_v24 }
 0x1a9   : > { %v1502_v25 = vpop.permute.xlu1 %1501  ;;  %v3730_v26 = vld [vmem:[#allocation2 + $0x88] sm:$0xff] }
 0x1aa   : > { %1579 = vst.msk [vmem:[#allocation2 + $0xa8] sm:$0xff] %vm1559_vm10, %v1502_v25  ;;  %2986 = vmatmul.mubr.msk.f32.gmra.mrb[14].mxu1 %vm367_vm0, %v3730_v26  ;;  %3069 = vmatmul.mubr.msk.f32.vlgmr.msra.gmra.mrb[0].mxu0 %vm367_vm0, %v3667_v5 }
 0x1ab   : > { %3071 = vmatprep.mubr.msk.f32.mxu0 %vm367_vm0, %v1598_v59  ;;  %v1504_v27 = vpop.permute.xlu0 %1503  ;;  %v3738_v28 = vld [vmem:[#allocation2 + $0x90] sm:$0xff] }
 0x1ac   : > { %1580 = vst.msk [vmem:[#allocation2 + $0xb0] sm:$0xff] %vm1559_vm10, %v1504_v27  ;;  %2988 = vmatprep.mubr.msk.f32.mxu1 %vm367_vm0, %v3738_v28  ;;  %v3214_v27 = vld [vmem:[%s3311_s25 + $0x18] sm:$0xff] }
 0x1ad   : > { %v1506_v29 = vpop.permute.xlu1 %1505  ;;  %v3743_v30 = vld [vmem:[#allocation2 + $0x98] sm:$0xff] }
 0x1ae   : > { %1581 = vst.msk [vmem:[#allocation2 + $0xb8] sm:$0xff] %vm1559_vm10, %v1506_v29  ;;  %2989 = vmatmul.mubr.msk.f32.gmra.mrb[16].mxu1 %vm367_vm0, %v3743_v30  ;;  %3072 = vmatmul.mubr.msk.f32.gmra.mrb[2].mxu0 %vm367_vm0, %v3677_v1 }
 0x1af   : > { %3074 = vmatprep.mubr.msk.f32.mxu0 %vm367_vm0, %v1600_v9  ;;  %v1508_v31 = vpop.permute.xlu0 %1507  ;;  %v3751_v32 = vld [vmem:[#allocation2 + $0xa0] sm:$0xff] }
 0x1b0   : > { %1582 = vst.msk [vmem:[#allocation2 + $0xc0] sm:$0xff] %vm1559_vm10, %v1508_v31  ;;  %2991 = vmatprep.mubr.msk.f32.mxu1 %vm367_vm0, %v3751_v32  ;;  %v3215_v31 = vld [vmem:[%s3311_s25 + $0x10] sm:$0xff] }
 0x1b1   : > { %v1510_v33 = vpop.permute.xlu1 %1509  ;;  %v3756_v34 = vld [vmem:[#allocation2 + $0xa8] sm:$0xff] }
 0x1b2   : > { %1583 = vst.msk [vmem:[#allocation2 + $0xc8] sm:$0xff] %vm1559_vm10, %v1510_v33  ;;  %2992 = vmatmul.mubr.msk.f32.gmra.mrb[18].mxu1 %vm367_vm0, %v3756_v34  ;;  %3075 = vmatmul.mubr.msk.f32.gmra.mrb[4].mxu0 %vm367_vm0, %v3687_v10 }
 0x1b3   : > { %3077 = vmatprep.mubr.msk.f32.mxu0 %vm367_vm0, %v1602_v12  ;;  %v1512_v35 = vpop.permute.xlu0 %1511  ;;  %v1614_v36 = vld [vmem:[#allocation2 + $0xb0] sm:$0xff] }
 0x1b4   : > { %1584 = vst.msk [vmem:[#allocation2 + $0xd0] sm:$0xff] %vm1559_vm10, %v1512_v35  ;;  %2994 = vmatprep.mubr.msk.f32.mxu1 %vm367_vm0, %v1614_v36 }
 0x1b5   : > { %v1514_v37 = vpop.permute.xlu1 %1513  ;;  %v1615_v38 = vld [vmem:[#allocation2 + $0xb8] sm:$0xff] }
 0x1b6   : > { %1585 = vst.msk [vmem:[#allocation2 + $0xd8] sm:$0xff] %vm1559_vm10, %v1514_v37  ;;  %2995 = vmatmul.mubr.msk.f32.gmra.mrb[20].mxu1 %vm367_vm0, %v1615_v38  ;;  %3078 = vmatmul.mubr.msk.f32.gmra.mrb[6].mxu0 %vm367_vm0, %v3697_v14  ;;  %v3216_v37 = vld [vmem:[%s3311_s25 + $0x28] sm:$0xff] }
 0x1b7   : > { %3080 = vmatprep.mubr.msk.f32.mxu0 %vm367_vm0, %v1604_v16  ;;  %v1516_v39 = vpop.permute.xlu0 %1515  ;;  %v1616_v40 = vld [vmem:[#allocation2 + $0xc0] sm:$0xff] }
 0x1b8   : > { %1586 = vst.msk [vmem:[#allocation2 + $0xe0] sm:$0xff] %vm1559_vm10, %v1516_v39  ;;  %2997 = vmatprep.mubr.msk.f32.mxu1 %vm367_vm0, %v1616_v40 }
 0x1b9   : > { %v1518_v41 = vpop.permute.xlu1 %1517  ;;  %v1617_v42 = vld [vmem:[#allocation2 + $0xc8] sm:$0xff] }
 0x1ba   : > { %1587 = vst.msk [vmem:[#allocation2 + $0xe8] sm:$0xff] %vm1559_vm10, %v1518_v41  ;;  %2998 = vmatmul.mubr.msk.f32.gmra.mrb[22].mxu1 %vm367_vm0, %v1617_v42  ;;  %3081 = vmatmul.mubr.msk.f32.gmra.mrb[8].mxu0 %vm367_vm0, %v3707_v18  ;;  %v3217_v41 = vld [vmem:[%s3311_s25 + $0x20] sm:$0xff] }
 0x1bb   : > { %3083 = vmatprep.mubr.msk.f32.mxu0 %vm367_vm0, %v1606_v20  ;;  %v1520_v43 = vpop.permute.xlu0 %1519  ;;  %v1618_v44 = vld [vmem:[#allocation2 + $0xd0] sm:$0xff] }
 0x1bc   : > { %1588 = vst.msk [vmem:[#allocation2 + $0xf0] sm:$0xff] %vm1559_vm10, %v1520_v43  ;;  %3000 = vmatprep.mubr.msk.f32.mxu1 %vm367_vm0, %v1618_v44 }
 0x1bd   : > { %v1522_v45 = vpop.permute.xlu1 %1521  ;;  %v1619_v46 = vld [vmem:[#allocation2 + $0xd8] sm:$0xff] }
 0x1be   : > { %1589 = vst.msk [vmem:[#allocation2 + $0xf8] sm:$0xff] %vm1559_vm10, %v1522_v45  ;;  %3001 = vmatmul.mubr.msk.f32.gmra.mrb[24].mxu1 %vm367_vm0, %v1619_v46  ;;  %3084 = vmatmul.mubr.msk.f32.gmra.mrb[10].mxu0 %vm367_vm0, %v3717_v22 }
 0x1bf   : > { %3086 = vmatprep.mubr.msk.f32.mxu0 %vm367_vm0, %v3725_v24  ;;  %v1524_v47 = vpop.permute.xlu0 %1523  ;;  %v1620_v48 = vld [vmem:[#allocation2 + $0xe0] sm:$0xff] }
 0x1c0   : > { %1590 = vst.msk [vmem:[#allocation2 + $0x100] sm:$0xff] %vm1559_vm10, %v1524_v47  ;;  %3003 = vmatprep.mubr.msk.f32.mxu1 %vm367_vm0, %v1620_v48  ;;  %v3218_v47 = vld [vmem:[%s3311_s25 + $0x38] sm:$0xff] }
 0x1c1   : > { %v1526_v49 = vpop.permute.xlu1 %1525  ;;  %v1621_v7 = vld [vmem:[#allocation2 + $0xe8] sm:$0xff] }
 0x1c2   : > { %1591 = vst.msk [vmem:[#allocation2 + $0x108] sm:$0xff] %vm1559_vm10, %v1526_v49  ;;  %3004 = vmatmul.mubr.msk.f32.gmra.mrb[26].mxu1 %vm367_vm0, %v1621_v7  ;;  %3087 = vmatmul.mubr.msk.f32.gmra.mrb[12].mxu0 %vm367_vm0, %v3730_v26 }
 0x1c3   : > { %3089 = vmatprep.mubr.msk.f32.mxu0 %vm367_vm0, %v3738_v28  ;;  %v1622_v50 = vld [vmem:[#allocation2 + $0xf0] sm:$0xff] }
 0x1c4   : > { %3006 = vmatprep.mubr.msk.f32.mxu1 %vm367_vm0, %v1622_v50 }
 0x1c5   : > { %v1623_v51 = vld [vmem:[#allocation2 + $0xf8] sm:$0xff] }
 0x1c6   : > { %3007 = vmatmul.mubr.msk.f32.gmra.mrb[28].mxu1 %vm367_vm0, %v1623_v51  ;;  %3090 = vmatmul.mubr.msk.f32.gmra.mrb[14].mxu0 %vm367_vm0, %v3743_v30 }
 0x1c7   : > { %3092 = vmatprep.mubr.msk.f32.mxu0 %vm367_vm0, %v3751_v32  ;;  %v1626_v52 = vld [vmem:[#allocation2 + $0x100] sm:$0xff] }
 0x1c8   : > { %3009 = vmatprep.mubr.msk.f32.mxu1 %vm367_vm0, %v1626_v52 }
 0x1c9   : > { %v1627_v53 = vld [vmem:[#allocation2 + $0x108] sm:$0xff] }
 0x1ca   : > { %3010 = vmatmul.mubr.msk.f32.gmra.mrb[30].mxu1 %vm367_vm0, %v1627_v53  ;;  %3093 = vmatmul.mubr.msk.f32.gmra.mrb[16].mxu0 %vm367_vm0, %v3756_v34 }
 0x1cb   : > { %3040 = vmatprep.mubr.msk.f32.mxu1 %vm367_vm0, %v3725_v24  ;;  %3095 = vmatprep.mubr.msk.f32.mxu0 %vm367_vm0, %v1614_v36 }
 0x1ce   : > { %3041 = vmatmul.mubr.msk.f32.vlgmr.msra.gmra.mrb[16].mxu1 %vm367_vm0, %v3730_v26  ;;  %3096 = vmatmul.mubr.msk.f32.gmra.mrb[18].mxu0 %vm367_vm0, %v1615_v38 }
 0x1cf   : > { %3043 = vmatprep.mubr.msk.f32.mxu1 %vm367_vm0, %v3738_v28  ;;  %3098 = vmatprep.mubr.msk.f32.mxu0 %vm367_vm0, %v1616_v40 }
 0x1d2   : > { %3044 = vmatmul.mubr.msk.f32.gmra.mrb[18].mxu1 %vm367_vm0, %v3743_v30  ;;  %3099 = vmatmul.mubr.msk.f32.gmra.mrb[20].mxu0 %vm367_vm0, %v1617_v42 }
 0x1d3   : > { %3046 = vmatprep.mubr.msk.f32.mxu1 %vm367_vm0, %v3751_v32  ;;  %3101 = vmatprep.mubr.msk.f32.mxu0 %vm367_vm0, %v1618_v44 }
 0x1d6   : > { %3047 = vmatmul.mubr.msk.f32.gmra.mrb[20].mxu1 %vm367_vm0, %v3756_v34  ;;  %3102 = vmatmul.mubr.msk.f32.gmra.mrb[22].mxu0 %vm367_vm0, %v1619_v46 }
 0x1d7   : > { %3049 = vmatprep.mubr.msk.f32.mxu1 %vm367_vm0, %v1614_v36  ;;  %3104 = vmatprep.mubr.msk.f32.mxu0 %vm367_vm0, %v1620_v48 }
 0x1da   : > { %3050 = vmatmul.mubr.msk.f32.gmra.mrb[22].mxu1 %vm367_vm0, %v1615_v38  ;;  %3105 = vmatmul.mubr.msk.f32.gmra.mrb[24].mxu0 %vm367_vm0, %v1621_v7 }
 0x1db   : > { %3052 = vmatprep.mubr.msk.f32.mxu1 %vm367_vm0, %v1616_v40  ;;  %3107 = vmatprep.mubr.msk.f32.mxu0 %vm367_vm0, %v1622_v50 }
 0x1de   : > { %3053 = vmatmul.mubr.msk.f32.gmra.mrb[24].mxu1 %vm367_vm0, %v1617_v42  ;;  %3108 = vmatmul.mubr.msk.f32.gmra.mrb[26].mxu0 %vm367_vm0, %v1623_v51 }
 0x1df   : > { %3055 = vmatprep.mubr.msk.f32.mxu1 %vm367_vm0, %v1618_v44  ;;  %3110 = vmatprep.mubr.msk.f32.mxu0 %vm367_vm0, %v1626_v52 }
 0x1e2   : > { %3056 = vmatmul.mubr.msk.f32.gmra.mrb[26].mxu1 %vm367_vm0, %v1619_v46  ;;  %3111 = vmatmul.mubr.msk.f32.gmra.mrb[28].mxu0 %vm367_vm0, %v1627_v53 }
 0x1e3   : > { %3058 = vmatprep.mubr.msk.f32.mxu1 %vm367_vm0, %v1620_v48  ;;  %3113 = vmatprep.mubr.msk.f32.mxu0 %vm367_vm0, %v2220_v54 }
 0x1e6   : > { %3059 = vmatmul.mubr.msk.f32.gmra.mrb[28].mxu1 %vm367_vm0, %v1621_v7  ;;  %3114 = vmatmul.mubr.msk.f32.gmra.mrb[30].mxu0 %vm367_vm0, %v2221_v55 }
 0x1e7   : > { %3061 = vmatprep.mubr.msk.f32.mxu1 %vm367_vm0, %v1622_v50  ;;  %v3219_v50 = vld [vmem:[%s3311_s25 + $0x30] sm:$0xff] }
 0x1ea   : > { %3062 = vmatmul.mubr.msk.f32.gmra.mrb[30].mxu1 %vm367_vm0, %v1623_v51 }
 0x261   : > { %v2966_v56 = vpop.f32.mrb[0].mxu1 }
 0x262   : > { %v1797_v58 = vpop.f32.mrb[1].mxu1 }
 0x265   : > { %v2969_v60 = vpop.f32.mrb[2].mxu1 }
 0x266   : > { %v1807_v61 = vpop.f32.mrb[3].mxu1 }
 0x269   : > { %v2972_v62 = vpop.f32.mrb[4].mxu1 }
 0x26a   : > { %v1817_v63 = vpop.f32.mrb[5].mxu1 }
 0x26d   : > { %v2975_v0 = vpop.f32.mrb[6].mxu1 }
 0x26e   : > { %v1827_v3 = vpop.f32.mrb[7].mxu1 }
 0x271   : > { %v2978_v4 = vpop.f32.mrb[8].mxu1 }
 0x272   : > { %v1837_v5 = vpop.f32.mrb[9].mxu1 }
 0x275   : > { %v3840_v57 = vpop.f32.mrb[10].mxu1 }
 0x276   : > { %v3842_v59 = vpop.f32.mrb[11].mxu1 }
 0x279   : > { %v3844_v6 = vpop.f32.mrb[12].mxu1 }
 0x27a   : > { %v3846_v1 = vpop.f32.mrb[13].mxu1 }
 0x27d   : > { %v3848_v8 = vpop.f32.mrb[14].mxu1  ;;  %v3070_v9 = vpop.f32.mrb[0].mxu0 }
 0x27e   : > { %v3136_v10 = vadd.f32 %v3070_v9, %v2966_v56  ;;  %v3855_v11 = vpop.f32.mrb[15].mxu1  ;;  %v2390_v12 = vpop.f32.mrb[1].mxu0  ;;  %v3220_v56 = vld [vmem:[%s3311_s25 + $0x48] sm:$0xff]  ;;  %v3222_v9 = vld [vmem:[%s3311_s25 + $0x58] sm:$0xff] }
 0x27f   : > { %v3137_v13 = vadd.f32 %v2390_v12, %v1797_v58 }
 0x280   : > { %v2589_v14 = vadd.f32 %v3136_v10, %v3853_v2 }
 0x281   : > { %v2588_v15 = vadd.f32 %v3137_v13, %v3853_v2  ;;  %v3073_v16 = vpop.f32.mrb[2].mxu0  ;;  %v3223_v13 = vld [vmem:[%s3311_s25 + $0x50] sm:$0xff] }
 0x282   : > { %v2621_v18 = vadd.f32 %v3212_v17, %v2589_v14  ;;  %v3138_v19 = vadd.f32 %v3073_v16, %v2969_v60  ;;  %v2400_v20 = vpop.f32.mrb[3].mxu0 }
 0x283   : > { %v2620_v22 = vadd.f32 %v3213_v21, %v2588_v15  ;;  %v3139_v23 = vadd.f32 %v2400_v20, %v1807_v61  ;;  %v3225_v21 = vld [vmem:[%s3311_s25 + $0x60] sm:$0xff] }
 0x284   : > { %2653 = vst.msk [vmem:[%s3863_s24 + $0x8] sm:$0xff] %vm1270_vm1, %v2621_v18  ;;  %v2591_v24 = vadd.f32 %v3138_v19, %v3853_v2  ;;  %v3224_v18 = vld [vmem:[%s3311_s25 + $0x68] sm:$0xff] }
 0x285   : > { %2652 = vst.msk [vmem:[%s3863_s24] sm:$0xff] %vm1270_vm1, %v2620_v22  ;;  %v2590_v25 = vadd.f32 %v3139_v23, %v3853_v2  ;;  %v3076_v26 = vpop.f32.mrb[4].mxu0 }
 0x286   : > { %v2623_v28 = vadd.f32 %v3214_v27, %v2591_v24  ;;  %v3140_v29 = vadd.f32 %v3076_v26, %v2972_v62  ;;  %v2410_v30 = vpop.f32.mrb[5].mxu0  ;;  %v3221_v62 = vld [vmem:[%s3311_s25 + $0x40] sm:$0xff]  ;;  %v3226_v26 = vld [vmem:[%s3311_s25 + $0x78] sm:$0xff] }
 0x287   : > { %v2622_v32 = vadd.f32 %v3215_v31, %v2590_v25  ;;  %v3141_v33 = vadd.f32 %v2410_v30, %v1817_v63 }
 0x288   : > { %2655 = vst.msk [vmem:[%s3863_s24 + $0x18] sm:$0xff] %vm1270_vm1, %v2623_v28  ;;  %v2593_v34 = vadd.f32 %v3140_v29, %v3853_v2 }
 0x289   : > { %2654 = vst.msk [vmem:[%s3863_s24 + $0x10] sm:$0xff] %vm1270_vm1, %v2622_v32  ;;  %v2592_v35 = vadd.f32 %v3141_v33, %v3853_v2  ;;  %v3079_v36 = vpop.f32.mrb[6].mxu0 }
 0x28a   : > { %v2625_v38 = vadd.f32 %v3216_v37, %v2593_v34  ;;  %v3142_v39 = vadd.f32 %v3079_v36, %v2975_v0  ;;  %v2420_v40 = vpop.f32.mrb[7].mxu0 }
 0x28b   : > { %v2624_v42 = vadd.f32 %v3217_v41, %v2592_v35  ;;  %v3143_v43 = vadd.f32 %v2420_v40, %v1827_v3 }
 0x28c   : > { %2657 = vst.msk [vmem:[%s3863_s24 + $0x28] sm:$0xff] %vm1270_vm1, %v2625_v38  ;;  %v2595_v44 = vadd.f32 %v3142_v39, %v3853_v2  ;;  %v3228_v39 = vld [vmem:[%s3311_s25 + $0x88] sm:$0xff] }
 0x28d   : > { %2656 = vst.msk [vmem:[%s3863_s24 + $0x20] sm:$0xff] %vm1270_vm1, %v2624_v42  ;;  %v2594_v45 = vadd.f32 %v3143_v43, %v3853_v2  ;;  %v3082_v46 = vpop.f32.mrb[8].mxu0 }
 0x28e   : > { %v2627_v48 = vadd.f32 %v3218_v47, %v2595_v44  ;;  %v3144_v49 = vadd.f32 %v3082_v46, %v2978_v4  ;;  %v2430_v7 = vpop.f32.mrb[9].mxu0  ;;  %v3229_v44 = vld [vmem:[%s3311_s25 + $0x80] sm:$0xff] }
 0x28f   : > { %v2626_v51 = vadd.f32 %v3219_v50, %v2594_v45  ;;  %v3145_v52 = vadd.f32 %v2430_v7, %v1837_v5  ;;  %v3230_v50 = vld [vmem:[%s3311_s25 + $0x98] sm:$0xff] }
 0x290   : > { %2659 = vst.msk [vmem:[%s3863_s24 + $0x38] sm:$0xff] %vm1270_vm1, %v2627_v48  ;;  %v2597_v53 = vadd.f32 %v3144_v49, %v3853_v2 }
 0x291   : > { %2658 = vst.msk [vmem:[%s3863_s24 + $0x30] sm:$0xff] %vm1270_vm1, %v2626_v51  ;;  %v2596_v54 = vadd.f32 %v3145_v52, %v3853_v2  ;;  %v3085_v55 = vpop.f32.mrb[10].mxu0 }
 0x292   : > { %v2629_v58 = vadd.f32 %v3220_v56, %v2597_v53  ;;  %v3146_v60 = vadd.f32 %v3085_v55, %v3840_v57  ;;  %v2440_v61 = vpop.f32.mrb[11].mxu0  ;;  %v3231_v55 = vld [vmem:[%s3311_s25 + $0x90] sm:$0xff] }
 0x293   : > { %v2628_v63 = vadd.f32 %v3221_v62, %v2596_v54  ;;  %v3147_v0 = vadd.f32 %v2440_v61, %v3842_v59 }
 0x294   : > { %2661 = vst.msk [vmem:[%s3863_s24 + $0x48] sm:$0xff] %vm1270_vm1, %v2629_v58  ;;  %v2599_v3 = vadd.f32 %v3146_v60, %v3853_v2 }
 0x295   : > { %2660 = vst.msk [vmem:[%s3863_s24 + $0x40] sm:$0xff] %vm1270_vm1, %v2628_v63  ;;  %v2598_v4 = vadd.f32 %v3147_v0, %v3853_v2  ;;  %v3088_v5 = vpop.f32.mrb[12].mxu0  ;;  %v3232_v0 = vld [vmem:[%s3311_s25 + $0xa8] sm:$0xff] }
 0x296   : > { %v2631_v57 = vadd.f32 %v3222_v9, %v2599_v3  ;;  %v3148_v10 = vadd.f32 %v3088_v5, %v3844_v6  ;;  %v2450_v12 = vpop.f32.mrb[13].mxu0 }
 0x297   : > { %v2630_v14 = vadd.f32 %v3223_v13, %v2598_v4  ;;  %v3149_v59 = vadd.f32 %v2450_v12, %v3846_v1 }
 0x298   : > { %2663 = vst.msk [vmem:[%s3863_s24 + $0x58] sm:$0xff] %vm1270_vm1, %v2631_v57  ;;  %v2601_v15 = vadd.f32 %v3148_v10, %v3853_v2  ;;  %v3233_v57 = vld [vmem:[%s3311_s25 + $0xa0] sm:$0xff] }
 0x299   : > { %2662 = vst.msk [vmem:[%s3863_s24 + $0x50] sm:$0xff] %vm1270_vm1, %v2630_v14  ;;  %v2600_v16 = vadd.f32 %v3149_v59, %v3853_v2  ;;  %v3091_v17 = vpop.f32.mrb[14].mxu0 }
 0x29a   : > { %v2633_v6 = vadd.f32 %v3224_v18, %v2601_v15  ;;  %v3150_v19 = vadd.f32 %v3091_v17, %v3848_v8  ;;  %v2460_v20 = vpop.f32.mrb[15].mxu0  ;;  %v3227_v8 = vld [vmem:[%s3311_s25 + $0x70] sm:$0xff] }
 0x29b   : > { %v2632_v1 = vadd.f32 %v3225_v21, %v2600_v16  ;;  %v3151_v22 = vadd.f32 %v2460_v20, %v3855_v11  ;;  %v3234_v16 = vld [vmem:[%s3311_s25 + $0xb8] sm:$0xff]  ;;  %v3235_v20 = vld [vmem:[%s3311_s25 + $0xb0] sm:$0xff] }
 0x29c   : > { %2665 = vst.msk [vmem:[%s3863_s24 + $0x68] sm:$0xff] %vm1270_vm1, %v2633_v6  ;;  %v2603_v23 = vadd.f32 %v3150_v19, %v3853_v2 }
 0x29d   : > { %2664 = vst.msk [vmem:[%s3863_s24 + $0x60] sm:$0xff] %vm1270_vm1, %v2632_v1  ;;  %v2602_v24 = vadd.f32 %v3151_v22, %v3853_v2  ;;  %v3094_v25 = vpop.f32.mrb[16].mxu0 }
 0x29e   : > { %v2635_v27 = vadd.f32 %v3226_v26, %v2603_v23  ;;  %v2470_v28 = vpop.f32.mrb[17].mxu0  ;;  %v3236_v26 = vld [vmem:[%s3311_s25 + $0xc8] sm:$0xff] }
 0x29f   : > { %v2634_v29 = vadd.f32 %v3227_v8, %v2602_v24 }
 0x2a0   : > { %2667 = vst.msk [vmem:[%s3863_s24 + $0x78] sm:$0xff] %vm1270_vm1, %v2635_v27 }
 0x2a1   : > { %2666 = vst.msk [vmem:[%s3863_s24 + $0x70] sm:$0xff] %vm1270_vm1, %v2634_v29  ;;  %v3042_v11 = vpop.f32.mrb[16].mxu1  ;;  %v3097_v30 = vpop.f32.mrb[18].mxu0 }
 0x2a2   : > { %v3152_v31 = vadd.f32 %v3094_v25, %v3042_v11  ;;  %v2111_v32 = vpop.f32.mrb[17].mxu1  ;;  %v2480_v33 = vpop.f32.mrb[19].mxu0  ;;  %v3237_v11 = vld [vmem:[%s3311_s25 + $0xc0] sm:$0xff] }
 0x2a3   : > { %v3153_v34 = vadd.f32 %v2470_v28, %v2111_v32 }
 0x2a4   : > { %v2605_v35 = vadd.f32 %v3152_v31, %v3853_v2 }
 0x2a5   : > { %v2604_v36 = vadd.f32 %v3153_v34, %v3853_v2  ;;  %v3045_v37 = vpop.f32.mrb[18].mxu1  ;;  %v3100_v38 = vpop.f32.mrb[20].mxu0 }
 0x2a6   : > { %v2637_v40 = vadd.f32 %v3228_v39, %v2605_v35  ;;  %v3154_v41 = vadd.f32 %v3097_v30, %v3045_v37  ;;  %v2121_v42 = vpop.f32.mrb[19].mxu1  ;;  %v2490_v43 = vpop.f32.mrb[21].mxu0 }
 0x2a7   : > { %v2636_v45 = vadd.f32 %v3229_v44, %v2604_v36  ;;  %v3155_v46 = vadd.f32 %v2480_v33, %v2121_v42  ;;  %v3238_v36 = vld [vmem:[%s3311_s25 + $0xd8] sm:$0xff] }
 0x2a8   : > { %2669 = vst.msk [vmem:[%s3863_s24 + $0x88] sm:$0xff] %vm1270_vm1, %v2637_v40  ;;  %v2607_v47 = vadd.f32 %v3154_v41, %v3853_v2  ;;  %v3239_v41 = vld [vmem:[%s3311_s25 + $0xd0] sm:$0xff] }
 0x2a9   : > { %2668 = vst.msk [vmem:[%s3863_s24 + $0x80] sm:$0xff] %vm1270_vm1, %v2636_v45  ;;  %v2606_v48 = vadd.f32 %v3155_v46, %v3853_v2  ;;  %v3048_v49 = vpop.f32.mrb[20].mxu1  ;;  %v3103_v7 = vpop.f32.mrb[22].mxu0 }
 0x2aa   : > { %v2639_v51 = vadd.f32 %v3230_v50, %v2607_v47  ;;  %v3156_v52 = vadd.f32 %v3100_v38, %v3048_v49  ;;  %v2131_v53 = vpop.f32.mrb[21].mxu1  ;;  %v2500_v54 = vpop.f32.mrb[23].mxu0  ;;  %v3240_v47 = vld [vmem:[%s3311_s25 + $0xe8] sm:$0xff]  ;;  %v3241_v50 = vld [vmem:[%s3311_s25 + $0xe0] sm:$0xff] }
 0x2ab   : > { %v2638_v56 = vadd.f32 %v3231_v55, %v2606_v48  ;;  %v3157_v58 = vadd.f32 %v2490_v43, %v2131_v53  ;;  %v3242_v55 = vld [vmem:[%s3311_s25 + $0xf8] sm:$0xff] }
 0x2ac   : > { %2671 = vst.msk [vmem:[%s3863_s24 + $0x98] sm:$0xff] %vm1270_vm1, %v2639_v51  ;;  %v2609_v60 = vadd.f32 %v3156_v52, %v3853_v2 }
 0x2ad   : > { %2670 = vst.msk [vmem:[%s3863_s24 + $0x90] sm:$0xff] %vm1270_vm1, %v2638_v56  ;;  %v2608_v61 = vadd.f32 %v3157_v58, %v3853_v2  ;;  %v3051_v62 = vpop.f32.mrb[22].mxu1  ;;  %v3106_v63 = vpop.f32.mrb[24].mxu0  ;;  %v3243_v58 = vld [vmem:[%s3311_s25 + $0xf0] sm:$0xff] }
 0x2ae   : > { %v2641_v3 = vadd.f32 %v3232_v0, %v2609_v60  ;;  %v3158_v4 = vadd.f32 %v3103_v7, %v3051_v62  ;;  %v2141_v5 = vpop.f32.mrb[23].mxu1  ;;  %v2510_v9 = vpop.f32.mrb[25].mxu0 }
 0x2af   : > { %v2640_v10 = vadd.f32 %v3233_v57, %v2608_v61  ;;  %v3159_v12 = vadd.f32 %v2500_v54, %v2141_v5 }
 0x2b0   : > { %2673 = vst.msk [vmem:[%s3863_s24 + $0xa8] sm:$0xff] %vm1270_vm1, %v2641_v3  ;;  %v2611_v13 = vadd.f32 %v3158_v4, %v3853_v2 }
 0x2b1   : > { %2672 = vst.msk [vmem:[%s3863_s24 + $0xa0] sm:$0xff] %vm1270_vm1, %v2640_v10  ;;  %v2610_v14 = vadd.f32 %v3159_v12, %v3853_v2  ;;  %v3054_v59 = vpop.f32.mrb[24].mxu1  ;;  %v3109_v15 = vpop.f32.mrb[26].mxu0 }
 0x2b2   : > { %v2643_v17 = vadd.f32 %v3234_v16, %v2611_v13  ;;  %v3160_v18 = vadd.f32 %v3106_v63, %v3054_v59  ;;  %v2151_v6 = vpop.f32.mrb[25].mxu1  ;;  %v2520_v19 = vpop.f32.mrb[27].mxu0 }
 0x2b3   : > { %v2642_v21 = vadd.f32 %v3235_v20, %v2610_v14  ;;  %v3161_v1 = vadd.f32 %v2510_v9, %v2151_v6 }
 0x2b4   : > { %2675 = vst.msk [vmem:[%s3863_s24 + $0xb8] sm:$0xff] %vm1270_vm1, %v2643_v17  ;;  %v2613_v22 = vadd.f32 %v3160_v18, %v3853_v2 }
 0x2b5   : > { %2674 = vst.msk [vmem:[%s3863_s24 + $0xb0] sm:$0xff] %vm1270_vm1, %v2642_v21  ;;  %v2612_v23 = vadd.f32 %v3161_v1, %v3853_v2  ;;  %v3057_v24 = vpop.f32.mrb[26].mxu1  ;;  %v3112_v25 = vpop.f32.mrb[28].mxu0 }
 0x2b6   : > { %v2645_v27 = vadd.f32 %v3236_v26, %v2613_v22  ;;  %v3162_v28 = vadd.f32 %v3109_v15, %v3057_v24  ;;  %v2161_v8 = vpop.f32.mrb[27].mxu1  ;;  %v2530_v29 = vpop.f32.mrb[29].mxu0 }
 0x2b7   : > { %v2644_v30 = vadd.f32 %v3237_v11, %v2612_v23  ;;  %v3163_v31 = vadd.f32 %v2520_v19, %v2161_v8 }
 0x2b8   : > { %2677 = vst.msk [vmem:[%s3863_s24 + $0xc8] sm:$0xff] %vm1270_vm1, %v2645_v27  ;;  %v2615_v32 = vadd.f32 %v3162_v28, %v3853_v2 }
 0x2b9   : > { %2676 = vst.msk [vmem:[%s3863_s24 + $0xc0] sm:$0xff] %vm1270_vm1, %v2644_v30  ;;  %v2614_v33 = vadd.f32 %v3163_v31, %v3853_v2  ;;  %v3060_v34 = vpop.f32.mrb[28].mxu1  ;;  %v3115_v35 = vpop.f32.mrb[30].mxu0 }
 0x2ba   : > { %v2647_v37 = vadd.f32 %v3238_v36, %v2615_v32  ;;  %v3164_v38 = vadd.f32 %v3112_v25, %v3060_v34  ;;  %v2171_v39 = vpop.f32.mrb[29].mxu1  ;;  %v2540_v40 = vpop.f32.mrb[31].mxu0 }
 0x2bb   : > { %v2646_v42 = vadd.f32 %v3239_v41, %v2614_v33  ;;  %v3165_v43 = vadd.f32 %v2530_v29, %v2171_v39 }
 0x2bc   : > { %2679 = vst.msk [vmem:[%s3863_s24 + $0xd8] sm:$0xff] %vm1270_vm1, %v2647_v37  ;;  %v2617_v44 = vadd.f32 %v3164_v38, %v3853_v2 }
 0x2bd   : > { %2678 = vst.msk [vmem:[%s3863_s24 + $0xd0] sm:$0xff] %vm1270_vm1, %v2646_v42  ;;  %v2616_v45 = vadd.f32 %v3165_v43, %v3853_v2  ;;  %v3063_v46 = vpop.f32.mrb[30].mxu1 }
 0x2be   : > { %v2649_v48 = vadd.f32 %v3240_v47, %v2617_v44  ;;  %v3166_v49 = vadd.f32 %v3115_v35, %v3063_v46  ;;  %v2181_v7 = vpop.f32.mrb[31].mxu1 }
 0x2bf   : > { %v2648_v51 = vadd.f32 %v3241_v50, %v2616_v45  ;;  %v3167_v52 = vadd.f32 %v2540_v40, %v2181_v7 }
 0x2c0   : > { %2681 = vst.msk [vmem:[%s3863_s24 + $0xe8] sm:$0xff] %vm1270_vm1, %v2649_v48  ;;  %v2619_v53 = vadd.f32 %v3166_v49, %v3853_v2 }
 0x2c1   : > { %2680 = vst.msk [vmem:[%s3863_s24 + $0xe0] sm:$0xff] %vm1270_vm1, %v2648_v51  ;;  %v2618_v54 = vadd.f32 %v3167_v52, %v3853_v2 }
 0x2c2   : > { %v2651_v56 = vadd.f32 %v3242_v55, %v2619_v53 }
 0x2c3   : > { %v2650_v60 = vadd.f32 %v3243_v58, %v2618_v54 }
 0x2c4   : > { %2683 = vst.msk [vmem:[%s3863_s24 + $0xf8] sm:$0xff] %vm1270_vm1, %v2651_v56 }
 0x2c5   : > { %2682 = vst.msk [vmem:[%s3863_s24 + $0xf0] sm:$0xff] %vm1270_vm1, %v2650_v60 }
 0x2c6 PF: > { %s15_s18 = sadd.s32 1, %s3250_s18  }
 0x2c7   : > { %p12_p4 = scmp.ge.s32.totalorder %s15_s18, 4  }
 0x2c9   :  { %14 = sbr.rel (!%p12_p4) target bundleno = 1 (0x1), region = 72 }

</bundles_post_ra>
